<compile_context>
chip_gen: v7x
topology: tpu7x:2x2x1
jax: 0.10.0
libtpu: 0.0.40
codegen_flags: <defaults>
</compile_context>

<pallas_src>
import functools

import jax
import jax.numpy as jnp
import numpy as np
from jax import lax
from jax.experimental import pallas as pl
from jax.experimental.pallas import tpu as pltpu


def _round_up(x, m):
    return ((x + m - 1) // m) * m


def _wavenet_kernel(*refs, B_blk, T, Cpad, Fpad, Mpad, fw, dilations,
                    has_downsample, C0, F, pack0, packr):
    it = iter(refs)
    x_ref = next(it)
    if has_downsample:
        wd_ref = next(it)
        bd_ref = next(it)
    w0_ref = next(it); b0_ref = next(it)
    wr_ref = next(it); br_ref = next(it)
    w1_ref = next(it); b1_ref = next(it)
    w2_ref = next(it); b2_ref = next(it)
    out_ref = next(it)

    N = B_blk * T
    # Per-sample time index of every flattened row (hoisted, built once).
    t_local = lax.broadcasted_iota(jnp.int32, (N, 1), 0) % T

    def shifted(h, shift):
        # hs[b*T + t] = h[b*T + t - shift] for t >= shift, else 0 (causal,
        # per-sample).  Sublane roll on the flattened slab (XLU); rows that
        # would wrap across a sample boundary are exactly those with
        # t_local < shift, which the mask zeroes.
        if shift == 0:
            return h
        if shift >= T:
            return jnp.zeros_like(h)
        rolled = pltpu.roll(h, shift, axis=0)
        return jnp.where(t_local >= shift, rolled, 0.0)

    def dilated_conv(h, w_bf16, b_f32, dilation, c_real, packed):
        # h: (N, Cin_pad) f32 with lanes >= c_real exactly zero.
        # w: (K, Fpad) bf16, b: (1, Fpad) f32.  All fw taps fused into one
        # MXU matmul.
        if packed:
            # fw*c_real <= 128: all taps share one 128-lane group.  Tap k's
            # channels are lane-rolled to [k*c_real, (k+1)*c_real); the adds
            # are exact because operands have disjoint (zero-padded) support.
            acc = None
            for k in range(fw):
                hs = shifted(h, dilation * (fw - 1 - k))
                if k:
                    hs = pltpu.roll(hs, k * c_real, axis=1)
                acc = hs if acc is None else acc + hs
            hcat = acc
        else:
            parts = [shifted(h, dilation * (fw - 1 - k)) for k in range(fw)]
            hcat = jnp.concatenate(parts, axis=-1)
        return jnp.dot(hcat.astype(jnp.bfloat16), w_bf16,
                       preferred_element_type=jnp.float32) + b_f32

    x_bf = x_ref[...].reshape(N, Cpad)                 # (N, Cpad) bf16
    x = x_bf.astype(jnp.float32)

    if has_downsample:
        res = jnp.dot(x_bf, wd_ref[...],
                      preferred_element_type=jnp.float32) + bd_ref[...]
    else:
        res = x                                        # M == F, same padding

    cur = jnp.maximum(
        dilated_conv(x, w0_ref[...], b0_ref[...], dilations[0], C0, pack0)
        + res, 0.0)

    # TODO(synk): for very deep stacks use lax.fori_loop per equal-dilation
    # group (wr_ref[l] supports dynamic l) instead of full static unrolling.
    for l in range(len(dilations) - 1):
        conv_out = dilated_conv(cur, wr_ref[l], br_ref[l], dilations[l + 1],
                                F, packr)
        cur = jnp.maximum(conv_out + cur, 0.0)

    # Head 1: linear over the filter dim, lane-padded output.
    y = jnp.dot(cur.astype(jnp.bfloat16), w1_ref[...],
                preferred_element_type=jnp.float32) + b1_ref[...]  # (N, Mpad)

    # Head 2: ONE fused MXU matmul over the time dim for all B_blk samples.
    # Relayout (B_blk*T, Mpad) -> (T, B_blk*Mpad) via lane-aligned concat
    # (Mpad is a multiple of 128), then (T_out, T) @ (T, B_blk*Mpad).
    y_bf = y.astype(jnp.bfloat16)
    if B_blk > 1:
        y_t = jnp.concatenate(
            [y_bf[i * T:(i + 1) * T, :] for i in range(B_blk)], axis=-1)
    else:
        y_t = y_bf
    o_all = jnp.dot(w2_ref[...], y_t,
                    preferred_element_type=jnp.float32) + b2_ref[...]
    for i in range(B_blk):
        out_ref[i] = o_all[:, i * Mpad:(i + 1) * Mpad].astype(out_ref.dtype)


def wave_net_forward(x, params, *, fw, dilations, T_out, has_downsample,
                     b_block=None):
    """WaveNet forward as one Pallas kernel.  x: (B, T, M) -> (B, T_out, M)."""
    B, T, M = x.shape
    F = params["b0"].shape[-1]
    n_layers = len(dilations)
    assert n_layers >= 2, "this kernel assumes at least two conv layers"

    Cpad = _round_up(M, 128)     # lane-padded input-channel dim
    Fpad = _round_up(F, 128)     # lane-padded filter dim
    Mpad = _round_up(M, 128)     # lane-padded output-marker dim

    # Pack the fw taps into a single 128-lane group when they fit.
    pack0 = fw * M <= 128
    packr = fw * F <= 128
    K0 = 128 if pack0 else fw * Cpad
    Kr = 128 if packr else fw * Fpad

    # ---- lane-pad + bf16-cast parameters (plain JAX, outside the kernel) ----
    def pad2(a, rows, cols):
        return jnp.pad(a, ((0, rows - a.shape[0]), (0, cols - a.shape[1])))

    if pack0:
        w0 = pad2(params["w0"], K0, Fpad)              # rows stay at k*M + c
    else:
        w0 = params["w0"].reshape(fw, M, F)
        w0 = jnp.pad(w0, ((0, 0), (0, Cpad - M), (0, Fpad - F)))
        w0 = w0.reshape(K0, Fpad)
    w0 = w0.astype(jnp.bfloat16)
    b0 = pad2(params["b0"], 1, Fpad)

    if packr:
        wr = jnp.pad(params["wr"], ((0, 0), (0, Kr - fw * F), (0, Fpad - F)))
    else:
        wr = params["wr"].reshape(n_layers - 1, fw, F, F)
        wr = jnp.pad(wr, ((0, 0), (0, 0), (0, Fpad - F), (0, Fpad - F)))
        wr = wr.reshape(n_layers - 1, Kr, Fpad)
    wr = wr.astype(jnp.bfloat16)
    br = jnp.pad(params["br"], ((0, 0), (0, 0), (0, Fpad - F)))

    w1 = pad2(params["w1"], Fpad, Mpad).astype(jnp.bfloat16)
    b1 = pad2(params["b1"], 1, Mpad)
    w2 = params["w2"].astype(jnp.bfloat16)             # (T_out, T)
    b2 = params["b2"]                                  # (T_out, 1)

    # bf16 input halves the per-step DMA bytes; the residual is widened to f32
    # inside the kernel (one extra bf16 rounding, well within tolerance).
    x_p = jnp.pad(x.astype(jnp.bfloat16), ((0, 0), (0, 0), (0, Cpad - M)))

    # ---- per-generation resource sizing -------------------------------------
    try:
        vmem_cap = int(pltpu.get_tpu_info().vmem_capacity_bytes)
    except Exception:
        vmem_cap = 64 * 1024 * 1024                    # v7x-safe fallback
    vmem_budget = min(max(int(vmem_cap * 0.85), 32 * 1024 * 1024),
                      112 * 1024 * 1024)

    bytes_w = (((Cpad * Fpad * 2 + Fpad * 4) if has_downsample else 0)
               + K0 * Fpad * 2 + Fpad * 4
               + (n_layers - 1) * (Kr * Fpad * 2 + Fpad * 4)
               + Fpad * Mpad * 2 + Mpad * 4
               + T_out * T * 2 + T_out * 4)
    out_itemsize = jnp.dtype(x.dtype).itemsize

    def vmem_est(b):
        n = b * T
        tiles = 2 * b * T * Cpad * 2 + 2 * b * T_out * Mpad * out_itemsize
        acts = n * (Cpad + 3 * Fpad + max(K0, Kr) + 2 * Mpad) * 4
        return 2 * bytes_w + tiles + 2 * acts   # 2x: double-buffered weights,
                                                # slack on activation slabs

    if b_block is None:
        cands = [c for c in (32, 16, 8, 4, 2, 1) if B % c == 0]
        feasible = [c for c in cands if vmem_est(c) <= vmem_budget] or [1]
        # Prefer >= 2 grid steps so both v7x TensorCores get work; the cost on
        # single-TC v5e/v6e is one extra ~0.35us pipeline step.
        pref = [c for c in feasible if B // c >= 2]
        b_block = (pref or feasible)[0]
    assert B % b_block == 0, "batch must be divisible by b_block"
    grid = (B // b_block,)

    # ---- kernel inputs -------------------------------------------------------
    inputs = [x_p]
    in_specs = [pl.BlockSpec((b_block, T, Cpad), lambda b: (b, 0, 0))]

    def add_full(arr):
        # Grid-invariant weights: full-array block, constant index map.
        # TODO(synk): pipeline_mode=pl.Buffered(1) (or ANY + manual DMA
        # streaming of wr) would halve resident weight VMEM on v7x.
        inputs.append(arr)
        nd = arr.ndim
        in_specs.append(pl.BlockSpec(arr.shape, lambda b, _nd=nd: (0,) * _nd))

    if has_downsample:
        add_full(pad2(params["wd"], Cpad, Fpad).astype(jnp.bfloat16))
        add_full(pad2(params["bd"], 1, Fpad))
    add_full(w0); add_full(b0)
    add_full(wr); add_full(br)
    add_full(w1); add_full(b1)
    add_full(w2); add_full(b2)

    kernel = functools.partial(
        _wavenet_kernel, B_blk=b_block, T=T, Cpad=Cpad, Fpad=Fpad, Mpad=Mpad,
        fw=fw, dilations=tuple(dilations), has_downsample=has_downsample,
        C0=M, F=F, pack0=pack0, packr=packr)

    n_rows = b_block * T
    flops_step = (2 * n_rows * K0 * Fpad
                  + (n_layers - 1) * 2 * n_rows * Kr * Fpad
                  + (2 * n_rows * Cpad * Fpad if has_downsample else 0)
                  + 2 * n_rows * Fpad * Mpad
                  + 2 * b_block * T_out * T * Mpad)
    cost = pl.CostEstimate(
        flops=(B // b_block) * flops_step, transcendentals=0,
        bytes_accessed=int(x_p.size * 2 + B * T_out * Mpad * out_itemsize
                           + bytes_w))

    out_padded = pl.pallas_call(
        kernel,
        out_shape=jax.ShapeDtypeStruct((B, T_out, Mpad), x.dtype),
        grid=grid,
        in_specs=in_specs,
        out_specs=pl.BlockSpec((b_block, T_out, Mpad), lambda b: (b, 0, 0)),
        compiler_params=pltpu.CompilerParams(
            dimension_semantics=("parallel",),
            vmem_limit_bytes=vmem_budget),
        cost_estimate=cost,
    )(*inputs)
    # Padded output lanes M..Mpad hold the head-2 bias (not zero); slice off.
    return out_padded[:, :, :M]


def init_params(key, T, T_out, M, F, fw, layers_per_level, n_dilations):
    """Deterministic synthetic parameters matching the PyTorch module shapes."""
    dilation_rates = [2 ** i for i in range(n_dilations)]
    dilations = []
    for d in dilation_rates:
        dilations += [d] * layers_per_level
    n_layers = len(dilations)
    assert n_layers >= 2, "this kernel assumes at least two conv layers"

    keys = list(jax.random.split(key, 2 * n_layers + 6))
    ki = iter(keys)
    scale = 0.1

    def rnd(k, shape):
        return (scale * jax.random.normal(k, shape)).astype(jnp.float32)

    # torch Conv1d weight: (Cout, Cin, fw) -> packed (fw*Cin, Cout),
    # rows ordered [tap k, in-channel c]  (matches the kernel's tap packing).
    conv_ws, conv_bs = [], []
    n_in = M
    for _ in range(n_layers):
        w = rnd(next(ki), (F, n_in, fw))
        b = rnd(next(ki), (F,))
        packed = jnp.concatenate([w[:, :, k].T for k in range(fw)], axis=0)
        conv_ws.append(packed)
        conv_bs.append(b[None, :])
        n_in = F

    has_downsample = (M != F)
    params = {}
    if has_downsample:
        wd_t = rnd(next(ki), (F, M, 1))   # torch Conv1d(M, F, 1).weight
        bd_t = rnd(next(ki), (F,))
        params["wd"] = wd_t[:, :, 0].T    # (M, F)
        params["bd"] = bd_t[None, :]      # (1, F)
    else:
        next(ki); next(ki)

    w1_t = rnd(next(ki), (M, F))          # torch Linear(F, M).weight
    b1_t = rnd(next(ki), (M,))
    w2_t = rnd(next(ki), (T_out, T))      # torch Linear(T, T_out).weight
    b2_t = rnd(next(ki), (T_out,))

    params.update(
        w0=conv_ws[0], b0=conv_bs[0],                    # (fw*M, F), (1, F)
        wr=jnp.stack(conv_ws[1:], axis=0),               # (L-1, fw*F, F)
        br=jnp.stack(conv_bs[1:], axis=0),               # (L-1, 1, F)
        w1=w1_t.T, b1=b1_t[None, :],                     # (F, M), (1, M)
        w2=w2_t, b2=b2_t[:, None],                       # (T_out, T), (T_out,1)
    )
    return params, dilations, has_downsample


def ref_forward(x, params, dilations, fw, has_downsample):
    """Pure-JAX f32 reference mirroring the PyTorch forward semantics."""
    B, T, M = x.shape

    def conv(h, w_packed, b, d):
        cin = h.shape[-1]
        w = w_packed.reshape(fw, cin, -1)
        acc = jnp.zeros((B, T, w.shape[-1]), jnp.float32)
        for k in range(fw):
            shift = d * (fw - 1 - k)
            if shift >= T:
                continue
            if shift == 0:
                hs = h
            else:
                hs = jnp.concatenate(
                    [jnp.zeros((B, shift, cin), h.dtype),
                     h[:, :T - shift, :]], axis=1)
            acc = acc + jnp.einsum('btc,cf->btf', hs, w[k])
        return acc + b

    cur = x.astype(jnp.float32)
    if has_downsample:
        res = jnp.einsum('btm,mf->btf', cur, params["wd"]) + params["bd"]
    else:
        res = cur
    cur = jax.nn.relu(conv(cur, params["w0"], params["b0"], dilations[0]) + res)
    for l in range(len(dilations) - 1):
        cur = jax.nn.relu(
            conv(cur, params["wr"][l], params["br"][l], dilations[l + 1]) + cur)
    y = jnp.einsum('btf,fm->btm', cur, params["w1"]) + params["b1"]
    out = jnp.einsum('ot,btm->bom', params["w2"], y) + params["b2"][None]
    return out


if __name__ == "__main__":
    # Small, module-consistent shapes.
    B = 4
    input_length = 16
    output_length = 8
    n_markers = 4
    n_filters = 8
    filter_width = 3
    layers_per_level = 2
    n_dilations = 2

    key = jax.random.PRNGKey(0)
    kx, kp = jax.random.split(key)
    x = jax.random.normal(kx, (B, input_length, n_markers), jnp.float32)

    params, dilations, has_ds = init_params(
        kp, input_length, output_length, n_markers, n_filters,
        filter_width, layers_per_level, n_dilations)

    out = wave_net_forward(
        x, params, fw=filter_width, dilations=dilations,
        T_out=output_length, has_downsample=has_ds)
    out = jax.block_until_ready(out)

    ref = ref_forward(x, params, dilations, filter_width, has_ds)
    # bf16 matmul operands (f32 accumulation) vs. the pure-f32 reference.
    np.testing.assert_allclose(np.asarray(out), np.asarray(ref),
                               rtol=2e-2, atol=2e-2)
    print("KERNEL_OK")
</pallas_src>

<mosaic_0001>
module attributes {stable_mosaic.version = 11 : i64} {
  func.func @_wavenet_kernel(%arg0: i32, %arg1: memref<2x16x128xbf16, #tpu.memory_space<vmem>>, %arg2: memref<128x128xbf16, #tpu.memory_space<vmem>>, %arg3: memref<1x128xf32, #tpu.memory_space<vmem>>, %arg4: memref<128x128xbf16, #tpu.memory_space<vmem>>, %arg5: memref<1x128xf32, #tpu.memory_space<vmem>>, %arg6: memref<3x128x128xbf16, #tpu.memory_space<vmem>>, %arg7: memref<3x1x128xf32, #tpu.memory_space<vmem>>, %arg8: memref<128x128xbf16, #tpu.memory_space<vmem>>, %arg9: memref<1x128xf32, #tpu.memory_space<vmem>>, %arg10: memref<8x16xbf16, #tpu.memory_space<vmem>>, %arg11: memref<8x1xf32, #tpu.memory_space<vmem>>, %arg12: memref<2x8x128xf32, #tpu.memory_space<vmem>>) attributes {dimension_semantics = [#tpu.dimension_semantics<parallel>], iteration_bounds = array<i64: 2>, scalar_prefetch = 0 : i64, scratch_operands = 0 : i64, tpu.core_type = #tpu.core_type<tc>, window_params = [{transform_indices = @transform_0, window_bounds = array<i64: 2, 16, 128>}, {pipeline_mode = #tpu.pipeline_mode<synchronous>, transform_indices = @transform_1, window_bounds = array<i64: 128, 128>}, {pipeline_mode = #tpu.pipeline_mode<synchronous>, transform_indices = @transform_2, window_bounds = array<i64: 1, 128>}, {pipeline_mode = #tpu.pipeline_mode<synchronous>, transform_indices = @transform_3, window_bounds = array<i64: 128, 128>}, {pipeline_mode = #tpu.pipeline_mode<synchronous>, transform_indices = @transform_4, window_bounds = array<i64: 1, 128>}, {pipeline_mode = #tpu.pipeline_mode<synchronous>, transform_indices = @transform_5, window_bounds = array<i64: 3, 128, 128>}, {pipeline_mode = #tpu.pipeline_mode<synchronous>, transform_indices = @transform_6, window_bounds = array<i64: 3, 1, 128>}, {pipeline_mode = #tpu.pipeline_mode<synchronous>, transform_indices = @transform_7, window_bounds = array<i64: 128, 128>}, {pipeline_mode = #tpu.pipeline_mode<synchronous>, transform_indices = @transform_8, window_bounds = array<i64: 1, 128>}, {pipeline_mode = #tpu.pipeline_mode<synchronous>, transform_indices = @transform_9, window_bounds = array<i64: 8, 16>}, {pipeline_mode = #tpu.pipeline_mode<synchronous>, transform_indices = @transform_10, window_bounds = array<i64: 8, 1>}, {transform_indices = @transform_11, window_bounds = array<i64: 2, 8, 128>}]} {
    %0 = tpu.iota {dimensions = array<i32: 0>} : vector<32x1xi32>
    %c16_i32 = arith.constant 16 : i32
    %c0_i32 = arith.constant 0 : i32
    %1 = arith.cmpi eq, %c16_i32, %c0_i32 : i32
    %c1_i32 = arith.constant 1 : i32
    %2 = arith.select %1, %c1_i32, %c16_i32 : i32
    %3 = vector.broadcast %2 : i32 to vector<32x1xi32>
    %4 = arith.remsi %0, %3 : vector<32x1xi32>
    %c0_i32_0 = arith.constant 0 : i32
    %5 = vector.broadcast %c0_i32_0 : i32 to vector<32x1xi32>
    %6 = arith.cmpi ne, %4, %5 : vector<32x1xi32>
    %c0_i32_1 = arith.constant 0 : i32
    %7 = vector.broadcast %c0_i32_1 : i32 to vector<32x1xi32>
    %8 = arith.cmpi slt, %4, %7 : vector<32x1xi32>
    %c0_i32_2 = arith.constant 0 : i32
    %9 = arith.cmpi slt, %2, %c0_i32_2 : i32
    %10 = vector.broadcast %9 : i1 to vector<32x1xi1>
    %11 = vector.broadcast %10 : vector<32x1xi1> to vector<32x1xi1>
    %12 = arith.xori %8, %11 : vector<32x1xi1>
    %13 = arith.andi %12, %6 : vector<32x1xi1>
    %14 = vector.broadcast %2 : i32 to vector<32x1xi32>
    %15 = arith.addi %4, %14 : vector<32x1xi32>
    %16 = arith.select %13, %15, %4 : vector<32x1xi1>, vector<32x1xi32>
    %c0 = arith.constant 0 : index
    %c0_3 = arith.constant 0 : index
    %c0_4 = arith.constant 0 : index
    %17 = vector.load %arg1[%c0, %c0_3, %c0_4] : memref<2x16x128xbf16, #tpu.memory_space<vmem>>, vector<2x16x128xbf16>
    %18 = vector.shape_cast %17 : vector<2x16x128xbf16> to vector<32x128xbf16>
    %19 = arith.extf %18 : vector<32x128xbf16> to vector<32x128xf32>
    %c0_5 = arith.constant 0 : index
    %c0_6 = arith.constant 0 : index
    %20 = vector.load %arg2[%c0_5, %c0_6] : memref<128x128xbf16, #tpu.memory_space<vmem>>, vector<128x128xbf16>
    %cst = arith.constant dense<0.000000e+00> : vector<32x128xf32>
    %21 = tpu.matmul %18, %20, %cst {dimension_numbers = #tpu.dot_dimension_numbers<[1], [0], [0], [1], [0, 0, 1, 1], [], []>} : vector<32x128xbf16>, vector<128x128xbf16>, vector<32x128xf32> -> vector<32x128xf32>
    %c0_7 = arith.constant 0 : index
    %c0_8 = arith.constant 0 : index
    %22 = vector.load %arg3[%c0_7, %c0_8] : memref<1x128xf32, #tpu.memory_space<vmem>>, vector<1x128xf32>
    %23 = vector.broadcast %22 : vector<1x128xf32> to vector<32x128xf32>
    %24 = arith.addf %21, %23 : vector<32x128xf32>
    %c0_9 = arith.constant 0 : index
    %c0_10 = arith.constant 0 : index
    %25 = vector.load %arg4[%c0_9, %c0_10] : memref<128x128xbf16, #tpu.memory_space<vmem>>, vector<128x128xbf16>
    %c0_11 = arith.constant 0 : index
    %c0_12 = arith.constant 0 : index
    %26 = vector.load %arg5[%c0_11, %c0_12] : memref<1x128xf32, #tpu.memory_space<vmem>>, vector<1x128xf32>
    %c2_i32 = arith.constant 2 : i32
    %27 = tpu.dynamic_rotate %19 by %c2_i32 dim 0 : vector<32x128xf32>, i32 -> vector<32x128xf32>
    %c2_i32_13 = arith.constant 2 : i32
    %28 = vector.broadcast %c2_i32_13 : i32 to vector<32x1xi32>
    %29 = arith.cmpi sge, %16, %28 : vector<32x1xi32>
    %cst_14 = arith.constant 0.000000e+00 : f32
    %30 = vector.shape_cast %29 : vector<32x1xi1> to vector<32x1xi1>
    %31 = vector.broadcast %30 : vector<32x1xi1> to vector<32x128xi1>
    %32 = vector.broadcast %cst_14 : f32 to vector<32x128xf32>
    %33 = arith.select %31, %27, %32 : vector<32x128xi1>, vector<32x128xf32>
    %c1_i32_15 = arith.constant 1 : i32
    %34 = tpu.dynamic_rotate %19 by %c1_i32_15 dim 0 : vector<32x128xf32>, i32 -> vector<32x128xf32>
    %c1_i32_16 = arith.constant 1 : i32
    %35 = vector.broadcast %c1_i32_16 : i32 to vector<32x1xi32>
    %36 = arith.cmpi sge, %16, %35 : vector<32x1xi32>
    %cst_17 = arith.constant 0.000000e+00 : f32
    %37 = vector.shape_cast %36 : vector<32x1xi1> to vector<32x1xi1>
    %38 = vector.broadcast %37 : vector<32x1xi1> to vector<32x128xi1>
    %39 = vector.broadcast %cst_17 : f32 to vector<32x128xf32>
    %40 = arith.select %38, %34, %39 : vector<32x128xi1>, vector<32x128xf32>
    %c4_i32 = arith.constant 4 : i32
    %41 = tpu.dynamic_rotate %40 by %c4_i32 dim 1 : vector<32x128xf32>, i32 -> vector<32x128xf32>
    %42 = arith.addf %33, %41 : vector<32x128xf32>
    %c8_i32 = arith.constant 8 : i32
    %43 = tpu.dynamic_rotate %19 by %c8_i32 dim 1 : vector<32x128xf32>, i32 -> vector<32x128xf32>
    %44 = arith.addf %42, %43 : vector<32x128xf32>
    %45 = arith.truncf %44 : vector<32x128xf32> to vector<32x128xbf16>
    %cst_18 = arith.constant dense<0.000000e+00> : vector<32x128xf32>
    %46 = tpu.matmul %45, %25, %cst_18 {dimension_numbers = #tpu.dot_dimension_numbers<[1], [0], [0], [1], [0, 0, 1, 1], [], []>} : vector<32x128xbf16>, vector<128x128xbf16>, vector<32x128xf32> -> vector<32x128xf32>
    %47 = vector.broadcast %26 : vector<1x128xf32> to vector<32x128xf32>
    %48 = arith.addf %46, %47 : vector<32x128xf32>
    %49 = arith.addf %48, %24 : vector<32x128xf32>
    %cst_19 = arith.constant 0.000000e+00 : f32
    %50 = vector.broadcast %cst_19 : f32 to vector<32x128xf32>
    %51 = arith.maximumf %49, %50 : vector<32x128xf32>
    %c0_20 = arith.constant 0 : index
    %c0_21 = arith.constant 0 : index
    %c0_22 = arith.constant 0 : index
    %52 = vector.load %arg6[%c0_20, %c0_21, %c0_22] : memref<3x128x128xbf16, #tpu.memory_space<vmem>>, vector<1x128x128xbf16>
    %53 = vector.shape_cast %52 : vector<1x128x128xbf16> to vector<128x128xbf16>
    %c0_23 = arith.constant 0 : index
    %c0_24 = arith.constant 0 : index
    %c0_25 = arith.constant 0 : index
    %54 = vector.load %arg7[%c0_23, %c0_24, %c0_25] : memref<3x1x128xf32, #tpu.memory_space<vmem>>, vector<1x1x128xf32>
    %55 = vector.shape_cast %54 : vector<1x1x128xf32> to vector<1x128xf32>
    %c2_i32_26 = arith.constant 2 : i32
    %56 = tpu.dynamic_rotate %51 by %c2_i32_26 dim 0 : vector<32x128xf32>, i32 -> vector<32x128xf32>
    %c2_i32_27 = arith.constant 2 : i32
    %57 = vector.broadcast %c2_i32_27 : i32 to vector<32x1xi32>
    %58 = arith.cmpi sge, %16, %57 : vector<32x1xi32>
    %cst_28 = arith.constant 0.000000e+00 : f32
    %59 = vector.shape_cast %58 : vector<32x1xi1> to vector<32x1xi1>
    %60 = vector.broadcast %59 : vector<32x1xi1> to vector<32x128xi1>
    %61 = vector.broadcast %cst_28 : f32 to vector<32x128xf32>
    %62 = arith.select %60, %56, %61 : vector<32x128xi1>, vector<32x128xf32>
    %c1_i32_29 = arith.constant 1 : i32
    %63 = tpu.dynamic_rotate %51 by %c1_i32_29 dim 0 : vector<32x128xf32>, i32 -> vector<32x128xf32>
    %c1_i32_30 = arith.constant 1 : i32
    %64 = vector.broadcast %c1_i32_30 : i32 to vector<32x1xi32>
    %65 = arith.cmpi sge, %16, %64 : vector<32x1xi32>
    %cst_31 = arith.constant 0.000000e+00 : f32
    %66 = vector.shape_cast %65 : vector<32x1xi1> to vector<32x1xi1>
    %67 = vector.broadcast %66 : vector<32x1xi1> to vector<32x128xi1>
    %68 = vector.broadcast %cst_31 : f32 to vector<32x128xf32>
    %69 = arith.select %67, %63, %68 : vector<32x128xi1>, vector<32x128xf32>
    %c8_i32_32 = arith.constant 8 : i32
    %70 = tpu.dynamic_rotate %69 by %c8_i32_32 dim 1 : vector<32x128xf32>, i32 -> vector<32x128xf32>
    %71 = arith.addf %62, %70 : vector<32x128xf32>
    %c16_i32_33 = arith.constant 16 : i32
    %72 = tpu.dynamic_rotate %51 by %c16_i32_33 dim 1 : vector<32x128xf32>, i32 -> vector<32x128xf32>
    %73 = arith.addf %71, %72 : vector<32x128xf32>
    %74 = arith.truncf %73 : vector<32x128xf32> to vector<32x128xbf16>
    %cst_34 = arith.constant dense<0.000000e+00> : vector<32x128xf32>
    %75 = tpu.matmul %74, %53, %cst_34 {dimension_numbers = #tpu.dot_dimension_numbers<[1], [0], [0], [1], [0, 0, 1, 1], [], []>} : vector<32x128xbf16>, vector<128x128xbf16>, vector<32x128xf32> -> vector<32x128xf32>
    %76 = vector.broadcast %55 : vector<1x128xf32> to vector<32x128xf32>
    %77 = arith.addf %75, %76 : vector<32x128xf32>
    %78 = arith.addf %77, %51 : vector<32x128xf32>
    %cst_35 = arith.constant 0.000000e+00 : f32
    %79 = vector.broadcast %cst_35 : f32 to vector<32x128xf32>
    %80 = arith.maximumf %78, %79 : vector<32x128xf32>
    %c1 = arith.constant 1 : index
    %c0_36 = arith.constant 0 : index
    %c0_37 = arith.constant 0 : index
    %81 = vector.load %arg6[%c1, %c0_36, %c0_37] : memref<3x128x128xbf16, #tpu.memory_space<vmem>>, vector<1x128x128xbf16>
    %82 = vector.shape_cast %81 : vector<1x128x128xbf16> to vector<128x128xbf16>
    %c1_38 = arith.constant 1 : index
    %c0_39 = arith.constant 0 : index
    %c0_40 = arith.constant 0 : index
    %83 = vector.load %arg7[%c1_38, %c0_39, %c0_40] : memref<3x1x128xf32, #tpu.memory_space<vmem>>, vector<1x1x128xf32>
    %84 = vector.shape_cast %83 : vector<1x1x128xf32> to vector<1x128xf32>
    %c4_i32_41 = arith.constant 4 : i32
    %85 = tpu.dynamic_rotate %80 by %c4_i32_41 dim 0 : vector<32x128xf32>, i32 -> vector<32x128xf32>
    %c4_i32_42 = arith.constant 4 : i32
    %86 = vector.broadcast %c4_i32_42 : i32 to vector<32x1xi32>
    %87 = arith.cmpi sge, %16, %86 : vector<32x1xi32>
    %cst_43 = arith.constant 0.000000e+00 : f32
    %88 = vector.shape_cast %87 : vector<32x1xi1> to vector<32x1xi1>
    %89 = vector.broadcast %88 : vector<32x1xi1> to vector<32x128xi1>
    %90 = vector.broadcast %cst_43 : f32 to vector<32x128xf32>
    %91 = arith.select %89, %85, %90 : vector<32x128xi1>, vector<32x128xf32>
    %c2_i32_44 = arith.constant 2 : i32
    %92 = tpu.dynamic_rotate %80 by %c2_i32_44 dim 0 : vector<32x128xf32>, i32 -> vector<32x128xf32>
    %c2_i32_45 = arith.constant 2 : i32
    %93 = vector.broadcast %c2_i32_45 : i32 to vector<32x1xi32>
    %94 = arith.cmpi sge, %16, %93 : vector<32x1xi32>
    %cst_46 = arith.constant 0.000000e+00 : f32
    %95 = vector.shape_cast %94 : vector<32x1xi1> to vector<32x1xi1>
    %96 = vector.broadcast %95 : vector<32x1xi1> to vector<32x128xi1>
    %97 = vector.broadcast %cst_46 : f32 to vector<32x128xf32>
    %98 = arith.select %96, %92, %97 : vector<32x128xi1>, vector<32x128xf32>
    %c8_i32_47 = arith.constant 8 : i32
    %99 = tpu.dynamic_rotate %98 by %c8_i32_47 dim 1 : vector<32x128xf32>, i32 -> vector<32x128xf32>
    %100 = arith.addf %91, %99 : vector<32x128xf32>
    %c16_i32_48 = arith.constant 16 : i32
    %101 = tpu.dynamic_rotate %80 by %c16_i32_48 dim 1 : vector<32x128xf32>, i32 -> vector<32x128xf32>
    %102 = arith.addf %100, %101 : vector<32x128xf32>
    %103 = arith.truncf %102 : vector<32x128xf32> to vector<32x128xbf16>
    %cst_49 = arith.constant dense<0.000000e+00> : vector<32x128xf32>
    %104 = tpu.matmul %103, %82, %cst_49 {dimension_numbers = #tpu.dot_dimension_numbers<[1], [0], [0], [1], [0, 0, 1, 1], [], []>} : vector<32x128xbf16>, vector<128x128xbf16>, vector<32x128xf32> -> vector<32x128xf32>
    %105 = vector.broadcast %84 : vector<1x128xf32> to vector<32x128xf32>
    %106 = arith.addf %104, %105 : vector<32x128xf32>
    %107 = arith.addf %106, %80 : vector<32x128xf32>
    %cst_50 = arith.constant 0.000000e+00 : f32
    %108 = vector.broadcast %cst_50 : f32 to vector<32x128xf32>
    %109 = arith.maximumf %107, %108 : vector<32x128xf32>
    %c2 = arith.constant 2 : index
    %c0_51 = arith.constant 0 : index
    %c0_52 = arith.constant 0 : index
    %110 = vector.load %arg6[%c2, %c0_51, %c0_52] : memref<3x128x128xbf16, #tpu.memory_space<vmem>>, vector<1x128x128xbf16>
    %111 = vector.shape_cast %110 : vector<1x128x128xbf16> to vector<128x128xbf16>
    %c2_53 = arith.constant 2 : index
    %c0_54 = arith.constant 0 : index
    %c0_55 = arith.constant 0 : index
    %112 = vector.load %arg7[%c2_53, %c0_54, %c0_55] : memref<3x1x128xf32, #tpu.memory_space<vmem>>, vector<1x1x128xf32>
    %113 = vector.shape_cast %112 : vector<1x1x128xf32> to vector<1x128xf32>
    %c4_i32_56 = arith.constant 4 : i32
    %114 = tpu.dynamic_rotate %109 by %c4_i32_56 dim 0 : vector<32x128xf32>, i32 -> vector<32x128xf32>
    %c4_i32_57 = arith.constant 4 : i32
    %115 = vector.broadcast %c4_i32_57 : i32 to vector<32x1xi32>
    %116 = arith.cmpi sge, %16, %115 : vector<32x1xi32>
    %cst_58 = arith.constant 0.000000e+00 : f32
    %117 = vector.shape_cast %116 : vector<32x1xi1> to vector<32x1xi1>
    %118 = vector.broadcast %117 : vector<32x1xi1> to vector<32x128xi1>
    %119 = vector.broadcast %cst_58 : f32 to vector<32x128xf32>
    %120 = arith.select %118, %114, %119 : vector<32x128xi1>, vector<32x128xf32>
    %c2_i32_59 = arith.constant 2 : i32
    %121 = tpu.dynamic_rotate %109 by %c2_i32_59 dim 0 : vector<32x128xf32>, i32 -> vector<32x128xf32>
    %c2_i32_60 = arith.constant 2 : i32
    %122 = vector.broadcast %c2_i32_60 : i32 to vector<32x1xi32>
    %123 = arith.cmpi sge, %16, %122 : vector<32x1xi32>
    %cst_61 = arith.constant 0.000000e+00 : f32
    %124 = vector.shape_cast %123 : vector<32x1xi1> to vector<32x1xi1>
    %125 = vector.broadcast %124 : vector<32x1xi1> to vector<32x128xi1>
    %126 = vector.broadcast %cst_61 : f32 to vector<32x128xf32>
    %127 = arith.select %125, %121, %126 : vector<32x128xi1>, vector<32x128xf32>
    %c8_i32_62 = arith.constant 8 : i32
    %128 = tpu.dynamic_rotate %127 by %c8_i32_62 dim 1 : vector<32x128xf32>, i32 -> vector<32x128xf32>
    %129 = arith.addf %120, %128 : vector<32x128xf32>
    %c16_i32_63 = arith.constant 16 : i32
    %130 = tpu.dynamic_rotate %109 by %c16_i32_63 dim 1 : vector<32x128xf32>, i32 -> vector<32x128xf32>
    %131 = arith.addf %129, %130 : vector<32x128xf32>
    %132 = arith.truncf %131 : vector<32x128xf32> to vector<32x128xbf16>
    %cst_64 = arith.constant dense<0.000000e+00> : vector<32x128xf32>
    %133 = tpu.matmul %132, %111, %cst_64 {dimension_numbers = #tpu.dot_dimension_numbers<[1], [0], [0], [1], [0, 0, 1, 1], [], []>} : vector<32x128xbf16>, vector<128x128xbf16>, vector<32x128xf32> -> vector<32x128xf32>
    %134 = vector.broadcast %113 : vector<1x128xf32> to vector<32x128xf32>
    %135 = arith.addf %133, %134 : vector<32x128xf32>
    %136 = arith.addf %135, %109 : vector<32x128xf32>
    %cst_65 = arith.constant 0.000000e+00 : f32
    %137 = vector.broadcast %cst_65 : f32 to vector<32x128xf32>
    %138 = arith.maximumf %136, %137 : vector<32x128xf32>
    %139 = arith.truncf %138 : vector<32x128xf32> to vector<32x128xbf16>
    %c0_66 = arith.constant 0 : index
    %c0_67 = arith.constant 0 : index
    %140 = vector.load %arg8[%c0_66, %c0_67] : memref<128x128xbf16, #tpu.memory_space<vmem>>, vector<128x128xbf16>
    %cst_68 = arith.constant dense<0.000000e+00> : vector<32x128xf32>
    %141 = tpu.matmul %139, %140, %cst_68 {dimension_numbers = #tpu.dot_dimension_numbers<[1], [0], [0], [1], [0, 0, 1, 1], [], []>} : vector<32x128xbf16>, vector<128x128xbf16>, vector<32x128xf32> -> vector<32x128xf32>
    %c0_69 = arith.constant 0 : index
    %c0_70 = arith.constant 0 : index
    %142 = vector.load %arg9[%c0_69, %c0_70] : memref<1x128xf32, #tpu.memory_space<vmem>>, vector<1x128xf32>
    %143 = vector.broadcast %142 : vector<1x128xf32> to vector<32x128xf32>
    %144 = arith.addf %141, %143 : vector<32x128xf32>
    %145 = arith.truncf %144 : vector<32x128xf32> to vector<32x128xbf16>
    %146 = vector.extract_strided_slice %145 {offsets = [0, 0], sizes = [16, 128], strides = [1, 1]} : vector<32x128xbf16> to vector<16x128xbf16>
    %147 = vector.extract_strided_slice %145 {offsets = [16, 0], sizes = [16, 128], strides = [1, 1]} : vector<32x128xbf16> to vector<16x128xbf16>
    %148 = tpu.concatenate %146, %147 in 1 : vector<16x128xbf16>, vector<16x128xbf16> -> vector<16x256xbf16>
    %c0_71 = arith.constant 0 : index
    %c0_72 = arith.constant 0 : index
    %149 = vector.load %arg10[%c0_71, %c0_72] : memref<8x16xbf16, #tpu.memory_space<vmem>>, vector<8x16xbf16>
    %cst_73 = arith.constant dense<0.000000e+00> : vector<8x256xf32>
    %150 = tpu.matmul %149, %148, %cst_73 {dimension_numbers = #tpu.dot_dimension_numbers<[1], [0], [0], [1], [0, 0, 1, 1], [], []>} : vector<8x16xbf16>, vector<16x256xbf16>, vector<8x256xf32> -> vector<8x256xf32>
    %c0_74 = arith.constant 0 : index
    %c0_75 = arith.constant 0 : index
    %151 = vector.load %arg11[%c0_74, %c0_75] : memref<8x1xf32, #tpu.memory_space<vmem>>, vector<8x1xf32>
    %152 = vector.broadcast %151 : vector<8x1xf32> to vector<8x256xf32>
    %153 = arith.addf %150, %152 : vector<8x256xf32>
    %154 = vector.extract_strided_slice %153 {offsets = [0, 0], sizes = [8, 128], strides = [1, 1]} : vector<8x256xf32> to vector<8x128xf32>
    %c0_76 = arith.constant 0 : index
    %c0_77 = arith.constant 0 : index
    %c0_78 = arith.constant 0 : index
    %155 = vector.load %arg12[%c0_76, %c0_77, %c0_78] : memref<2x8x128xf32, #tpu.memory_space<vmem>>, vector<1x8x128xf32>
    %156 = vector.shape_cast %155 : vector<1x8x128xf32> to vector<8x128xf32>
    %157 = vector.shape_cast %154 : vector<8x128xf32> to vector<1x8x128xf32>
    tpu.vector_store %arg12[%c0_76, %c0_77, %c0_78], %157 {strides = array<i32>} : memref<2x8x128xf32, #tpu.memory_space<vmem>>, vector<1x8x128xf32>,
    %158 = vector.extract_strided_slice %153 {offsets = [0, 128], sizes = [8, 128], strides = [1, 1]} : vector<8x256xf32> to vector<8x128xf32>
    %c1_79 = arith.constant 1 : index
    %c0_80 = arith.constant 0 : index
    %c0_81 = arith.constant 0 : index
    %159 = vector.load %arg12[%c1_79, %c0_80, %c0_81] : memref<2x8x128xf32, #tpu.memory_space<vmem>>, vector<1x8x128xf32>
    %160 = vector.shape_cast %159 : vector<1x8x128xf32> to vector<8x128xf32>
    %161 = vector.shape_cast %158 : vector<8x128xf32> to vector<1x8x128xf32>
    tpu.vector_store %arg12[%c1_79, %c0_80, %c0_81], %161 {strides = array<i32>} : memref<2x8x128xf32, #tpu.memory_space<vmem>>, vector<1x8x128xf32>,
    return
  }
  func.func @transform_0(%arg0: i32) -> (i32, i32, i32) {
    %c0_i32 = arith.constant 0 : i32
    %c0_i32_0 = arith.constant 0 : i32
    %c0_i32_1 = arith.constant 0 : i32
    return %arg0, %c0_i32, %c0_i32_0 : i32, i32, i32
  }
  func.func @transform_1(%arg0: i32) -> (i32, i32) {
    %c0_i32 = arith.constant 0 : i32
    %c0_i32_0 = arith.constant 0 : i32
    %c0_i32_1 = arith.constant 0 : i32
    return %c0_i32, %c0_i32_0 : i32, i32
  }
  func.func @transform_2(%arg0: i32) -> (i32, i32) {
    %c0_i32 = arith.constant 0 : i32
    %c0_i32_0 = arith.constant 0 : i32
    %c0_i32_1 = arith.constant 0 : i32
    return %c0_i32, %c0_i32_0 : i32, i32
  }
  func.func @transform_3(%arg0: i32) -> (i32, i32) {
    %c0_i32 = arith.constant 0 : i32
    %c0_i32_0 = arith.constant 0 : i32
    %c0_i32_1 = arith.constant 0 : i32
    return %c0_i32, %c0_i32_0 : i32, i32
  }
  func.func @transform_4(%arg0: i32) -> (i32, i32) {
    %c0_i32 = arith.constant 0 : i32
    %c0_i32_0 = arith.constant 0 : i32
    %c0_i32_1 = arith.constant 0 : i32
    return %c0_i32, %c0_i32_0 : i32, i32
  }
  func.func @transform_5(%arg0: i32) -> (i32, i32, i32) {
    %c0_i32 = arith.constant 0 : i32
    %c0_i32_0 = arith.constant 0 : i32
    %c0_i32_1 = arith.constant 0 : i32
    %c0_i32_2 = arith.constant 0 : i32
    return %c0_i32, %c0_i32_0, %c0_i32_1 : i32, i32, i32
  }
  func.func @transform_6(%arg0: i32) -> (i32, i32, i32) {
    %c0_i32 = arith.constant 0 : i32
    %c0_i32_0 = arith.constant 0 : i32
    %c0_i32_1 = arith.constant 0 : i32
    %c0_i32_2 = arith.constant 0 : i32
    return %c0_i32, %c0_i32_0, %c0_i32_1 : i32, i32, i32
  }
  func.func @transform_7(%arg0: i32) -> (i32, i32) {
    %c0_i32 = arith.constant 0 : i32
    %c0_i32_0 = arith.constant 0 : i32
    %c0_i32_1 = arith.constant 0 : i32
    return %c0_i32, %c0_i32_0 : i32, i32
  }
  func.func @transform_8(%arg0: i32) -> (i32, i32) {
    %c0_i32 = arith.constant 0 : i32
    %c0_i32_0 = arith.constant 0 : i32
    %c0_i32_1 = arith.constant 0 : i32
    return %c0_i32, %c0_i32_0 : i32, i32
  }
  func.func @transform_9(%arg0: i32) -> (i32, i32) {
    %c0_i32 = arith.constant 0 : i32
    %c0_i32_0 = arith.constant 0 : i32
    %c0_i32_1 = arith.constant 0 : i32
    return %c0_i32, %c0_i32_0 : i32, i32
  }
  func.func @transform_10(%arg0: i32) -> (i32, i32) {
    %c0_i32 = arith.constant 0 : i32
    %c0_i32_0 = arith.constant 0 : i32
    %c0_i32_1 = arith.constant 0 : i32
    return %c0_i32, %c0_i32_0 : i32, i32
  }
  func.func @transform_11(%arg0: i32) -> (i32, i32, i32) {
    %c0_i32 = arith.constant 0 : i32
    %c0_i32_0 = arith.constant 0 : i32
    %c0_i32_1 = arith.constant 0 : i32
    return %arg0, %c0_i32, %c0_i32_0 : i32, i32, i32
  }
}

</mosaic_0001>

<bundles_post_ra>
// kernel: tpu_custom_call.1
= control target key start
LH: loop header
LB: loop body
LE: loop exit
PB: predicated region body
PF: predicated region fallthrough
CT: control target
= control target key end

     0   :  { %s3000_s0 = inlined_call_operand.hbm [shape: bf16[4,16,128], index: 0, kind: input, shape index: {}]   ;;  %s3001_s1 = inlined_call_operand.hbm [shape: bf16[128,128], index: 1, kind: input, shape index: {}]   ;;  %s3002_s2 = inlined_call_operand.vmem [shape: f32[1,128], index: 2, kind: input, shape index: {}]   ;;  %s3003_s3 = inlined_call_operand.hbm [shape: bf16[128,128], index: 3, kind: input, shape index: {}]   ;;  %s3004_s4 = inlined_call_operand.vmem [shape: f32[1,128], index: 4, kind: input, shape index: {}]   ;;  %s3005_s5 = inlined_call_operand.hbm [shape: bf16[3,128,128], index: 5, kind: input, shape index: {}]   ;;  %s3006_s6 = inlined_call_operand.vmem [shape: f32[3,1,128], index: 6, kind: input, shape index: {}]   ;;  %s3007_s7 = inlined_call_operand.hbm [shape: bf16[128,128], index: 7, kind: input, shape index: {}]   ;;  %s3008_s8 = inlined_call_operand.vmem [shape: f32[1,128], index: 8, kind: input, shape index: {}]   ;;  %s3009_s9 = inlined_call_operand.vmem [shape: bf16[8,16], index: 9, kind: input, shape index: {}]   ;;  %s3010_s10 = inlined_call_operand.vmem [shape: f32[8,1], index: 10, kind: input, shape index: {}]   ;;  %s3011_s11 = inlined_call_operand.hbm [shape: f32[4,8,128], index: 11, kind: output, shape index: {}]  }
   0x1   :  { %3018 = sst [smem:[#allocation18_spill]] %s3008_s8 }
   0x2   :  { %3019 = sst [smem:[#allocation19_spill]] %s3009_s9 }
   0x3   :  { %3020 = sst [smem:[#allocation20_spill]] %s3011_s11 }
   0x4   :  { %16 = vsyncpa [#allocation3], 0 }
   0x5   :  { %18 = vsyncpa [#allocation3 + $0x1], 0 }
   0x6   :  { %19 = vsyncpa [#allocation6], 0 }
   0x7   :  { %20 = vsyncpa [#allocation9], 0 }
   0x8   :  { %21 = vsyncpa [#allocation4], 0 }
   0x9   :  { %23 = vsyncpa [#allocation4 + $0x1], 0  ;;  %s2463_s17 = smov 0   ;;  %s2465_s18 = smov 0  }
   0xa   :  { %s2467_s19 = smov 0   ;;  %s2469_s20 = smov 0  }
   0xb LB: > { %3021 = sst [smem:[#allocation16_spill]] %s2376_s17  ;;  %s2484_s21 = sadd.s32 4294967295, %s2388_s20   ;;  %s2388_s20 = sphi %s2469_s20, %s3047_s20   ;;  %s2384_s19 = sphi %s2467_s19, %s3046_s19   ;;  %s2380_s18 = sphi %s2465_s18, %s3045_s18   ;;  %s2376_s17 = sphi %s2463_s17, %s3044_s17  }
   0xc   : > { %s1719_s22 = sadd.s32 4294967294, %s2388_s20   ;;  %p49_p0 = scmp.ne.s32.totalorder %s2380_s18, %s2376_s17 }
   0xd   : > { %p3013_p1 = scmp.eq.s32.totalorder %s2484_s21, 0  ;;  %p289_p3 = scmp.eq.s32.totalorder %s1719_s22, 1 }
   0xe   : > { %p1720_p5 = scmp.ge.s32.totalorder %s2388_s20, 1  ;;  %p296_p7 = scmp.lt.s32.totalorder %s2388_s20, 3 }
   0xf   : > { %p2493_p4 = por %p3013_p1, %p49_p0  ;;  %p2498_p6 = por %p289_p3, %p49_p0 }
  0x10   : > { %p2503_p8 = pnand %p1720_p5, %p296_p7  ;;  %s2390_s26 = smov [#allocation5]  }
  0x11   : > { %s3022_s23 = scalar_select %p2493_p4, 1, 0 }
  0x12   : > { %s3023_s24 = scalar_select %p2498_p6, 1, 0 }
  0x13   : > { %s3025_s25 = scalar_select %p2503_p8, 1, 0 }
  0x14   : > { %3024 = sst [smem:[#allocation17_spill]] %s3023_s24  ;;  %s308_s27 = sshll.u32 %s2390_s26, 4  ;;  %s2507_s27 = int_to_ptr.vmem [resolvable:$true] %s308_s27 }
  0x15   : > { %p2017_p9 = pneg %p2503_p8  ;;  %s2391_s29 = smov [#allocation8]  }
  0x16   : > { %s340_s30 = sshll.u32 %s2391_s29, 4  ;;  %s2392_s12 = smov [#allocation7]   ;;  %s2518_s30 = int_to_ptr.vmem [resolvable:$true] %s340_s30 }
  0x17   : > { %p2514_p11 = pnand %p2017_p9, %p3013_p1  ;;  %s2520_s13 = sshll.u32 %s2392_s12, 4  ;;  %s325_s13 = int_to_ptr.vmem [resolvable:$true] %s2520_s13 }
  0x18   : > { %s2172_s16 = scalar_lea.hbm %s3001_s1, 1024 }
  0x19   : > { %p2173_p12 = scmp.ne.s32.totalorder %s3001_s1, %s2172_s16  ;;  %p2530_p13 = pneg %p2514_p11 }
  0x1a   : > { %p2179_p5 = scmp.lt.u32.totalorder %s2172_s16, %s3001_s1 }
  0x1b   : > { %p2175_p0 = pnand %p2530_p13, %p2173_p12 }
  0x1d   : > { %p2176_p3 = pneg %p2175_p0 }
  0x1f   : > { %p2181_p7 = pnand %p2179_p5, %p2176_p3 }
  0x21   : > { %2184 = shalt.err (!%p2181_p7)
}
  0x22   : > { %s2185_s14 = scalar_lea.vmem %s2507_s27, 1024  ;;  %p2193_p2 = scmp.lt.s32.totalorder %s2507_s27, %s2507_s27 }
  0x23   : > { %p2186_p9 = scmp.ne.s32.totalorder %s2507_s27, %s2185_s14  ;;  %p2194_p6 = scmp.lt.s32.totalorder %s2185_s14, %s2185_s14 }
  0x25   : > { %p2188_p10 = pnand %p2186_p9, %p2530_p13  ;;  %p2195_p12 = por %p2194_p6, %p2193_p2 }
  0x27   : > { %p2189_p1 = pneg %p2188_p10 }
  0x29   : > { %p2196_p0 = pnand %p2195_p12, %p2189_p1 }
  0x2b   : > { %2199 = shalt.err (!%p2196_p0)
}
  0x2c   : > { %s2393_s15 = smov 64   ;;  %s2394_s16 = smov 4  }
  0x2d   : > { %2020 = dma.hbm_to_vmem [thread:$0]  (!%p2514_p11), %s3001_s1, 1024, %s2507_s27, [#allocation6], %s2393_s15, %s2393_s15, %s2394_s16  }
  0x2e   : > { %s2200_s14 = scalar_lea.hbm %s3005_s5, 3072 }
  0x2f   : > { %p2201_p1 = scmp.ne.s32.totalorder %s3005_s5, %s2200_s14  ;;  %p2207_p10 = scmp.lt.u32.totalorder %s2200_s14, %s3005_s5 }
  0x31   : > { %p2203_p2 = pnand %p2201_p1, %p2530_p13 }
  0x33   : > { %p2204_p6 = pneg %p2203_p2 }
  0x35   : > { %p2209_p3 = pnand %p2207_p10, %p2204_p6 }
  0x37   : > { %2212 = shalt.err (!%p2209_p3)
}
  0x38   : > { %s2213_s27 = scalar_lea.vmem %s2518_s30, 3072  ;;  %p2221_p12 = scmp.lt.s32.totalorder %s2518_s30, %s2518_s30 }
  0x39   : > { %p2214_p5 = scmp.ne.s32.totalorder %s2518_s30, %s2213_s27  ;;  %p2222_p0 = scmp.lt.s32.totalorder %s2213_s27, %s2213_s27 }
  0x3b   : > { %p2216_p7 = pnand %p2214_p5, %p2530_p13  ;;  %p2223_p1 = por %p2222_p0, %p2221_p12 }
  0x3d   : > { %p2217_p9 = pneg %p2216_p7 }
  0x3f   : > { %p2224_p2 = pnand %p2223_p1, %p2217_p9 }
  0x41   : > { %2227 = shalt.err (!%p2224_p2)
}
  0x42   : > { %2026 = dma.hbm_to_vmem [thread:$0]  (!%p2514_p11), %s3005_s5, 3072, %s2518_s30, [#allocation9], %s2393_s15, %s2393_s15, %s2394_s16  }
  0x43   : > { %s2228_s22 = scalar_lea.hbm %s3003_s3, 1024 }
  0x44   : > { %p2229_p6 = scmp.ne.s32.totalorder %s3003_s3, %s2228_s22  ;;  %p2235_p5 = scmp.lt.u32.totalorder %s2228_s22, %s3003_s3 }
  0x46   : > { %p2231_p10 = pnand %p2229_p6, %p2530_p13 }
  0x48   : > { %p2232_p3 = pneg %p2231_p10 }
  0x4a   : > { %p2237_p7 = pnand %p2235_p5, %p2232_p3 }
  0x4c   : > { %2240 = shalt.err (!%p2237_p7)
}
  0x4d   : > { %s2241_s27 = scalar_lea.vmem %s325_s13, 1024  ;;  %p2249_p1 = scmp.lt.s32.totalorder %s325_s13, %s325_s13 }
  0x4e   : > { %p2242_p9 = scmp.ne.s32.totalorder %s325_s13, %s2241_s27  ;;  %p2250_p2 = scmp.lt.s32.totalorder %s2241_s27, %s2241_s27 }
  0x50   : > { %p2244_p12 = pnand %p2242_p9, %p2530_p13  ;;  %p2251_p4 = por %p2250_p2, %p2249_p1 }
  0x52   : > { %p2245_p0 = pneg %p2244_p12 }
  0x54   : > { %p2252_p8 = pnand %p2251_p4, %p2245_p0 }
  0x56   : > { %2255 = shalt.err (!%p2252_p8)
}
  0x57   : > { %2023 = dma.hbm_to_vmem [thread:$0]  (!%p2514_p11), %s3003_s3, 1024, %s325_s13, [#allocation6], %s2393_s15, %s2393_s15, %s2394_s16  }
  0x58   : > { %s2395_s9 = smov [#allocation10]   ;;  %s2256_s26 = scalar_lea.hbm %s3007_s7, 1024 }
  0x59   : > { %s356_s11 = sshll.u32 %s2395_s9, 4  ;;  %p2257_p4 = scmp.ne.s32.totalorder %s3007_s7, %s2256_s26  ;;  %s357_s11 = int_to_ptr.vmem [resolvable:$true] %s356_s11 }
  0x5a   : > { %p2263_p10 = scmp.lt.u32.totalorder %s2256_s26, %s3007_s7 }
  0x5b   : > { %p2259_p8 = pnand %p2257_p4, %p2530_p13 }
  0x5d   : > { %p2260_p6 = pneg %p2259_p8 }
  0x5f   : > { %p2265_p3 = pnand %p2263_p10, %p2260_p6 }
  0x61   : > { %2268 = shalt.err (!%p2265_p3)
}
  0x62   : > { %s2269_s13 = scalar_lea.vmem %s357_s11, 1024  ;;  %p2277_p12 = scmp.lt.s32.totalorder %s357_s11, %s357_s11 }
  0x63   : > { %p2270_p5 = scmp.ne.s32.totalorder %s357_s11, %s2269_s13  ;;  %p2278_p0 = scmp.lt.s32.totalorder %s2269_s13, %s2269_s13 }
  0x65   : > { %p2272_p7 = pnand %p2270_p5, %p2530_p13  ;;  %p2279_p1 = por %p2278_p0, %p2277_p12 }
  0x67   : > { %p2273_p9 = pneg %p2272_p7 }
  0x69   : > { %p2280_p2 = pnand %p2279_p1, %p2273_p9 }
  0x6b   : > { %2283 = shalt.err (!%p2280_p2)
}
  0x6c   : > { %2029 = dma.hbm_to_vmem [thread:$0]  (!%p2514_p11), %s3007_s7, 1024, %s357_s11, [#allocation9], %s2393_s15, %s2393_s15, %s2394_s16  }
  0x6d   : > { %s2624_s24 = sadd.s32 1, %s2388_s20   ;;  %s36_s28 = sadd.s32 1, %s2384_s19 }
  0x6e   : > { %s33_s9 = ssub.s32 %s2388_s20, %s2624_s24  ;;  %p43_p13 = scmp.ne.s32.totalorder %s2384_s19, %s2380_s18 }
  0x6f   : > { %p34_p4 = scmp.eq.s32.totalorder %s33_s9, 0  ;;  %p44_p8 = scmp.eq.s32.totalorder %s2388_s20, 0 }
  0x70   : > { %p3028_p6 = scmp.eq.s32.totalorder %s2484_s21, 1  ;;  %p2042_p3 = scmp.lt.s32.totalorder %s2388_s20, 2 }
  0x71   : > { %s2640_s22 = scalar_select %p34_p4, %s2384_s19, %s36_s28  }
  0x72   : > { %p2634_p10 = por %p3028_p6, %p43_p13  ;;  %p45_p5 = por %p44_p8, %p43_p13 }
  0x73   : > { %s379_s26 = sand.u32 1, %s2384_s19   ;;  %s1803_s11 = sshll.u32 %s2388_s20, 8 }
  0x74   : > { %s1726_s29 = sshll.u32 %s379_s26, 4  ;;  %s2647_s27 = scalar_lea.hbm %s3000_s0, %s1803_s11 }
  0x75   : > { %s383_s13 = scalar_lea.vmem [#allocation2], %s1726_s29  ;;  %p2651_p11 = pnand %p2042_p3, %p45_p5 }
  0x76   : > { %s391_s30 = sshll.u32 %s383_s13, 4  ;;  %s2655_s28 = scalar_lea.sflag [#allocation3], %s379_s26  ;;  %s2649_s30 = int_to_ptr.vmem [resolvable:$true] %s391_s30 }
  0x77   : > { %s2284_s9 = scalar_lea.hbm %s2647_s27, 256  ;;  %p2286_p9 = pneg %p2651_p11 }
  0x78   : > { %p2285_p7 = scmp.ne.s32.totalorder %s2647_s27, %s2284_s9  ;;  %s2289_s12 = scalar_lea.hbm %s3000_s0, 512 }
  0x79   : > { %p2290_p1 = scmp.lt.u32.totalorder %s2647_s27, %s3000_s0  ;;  %p2291_p2 = scmp.lt.u32.totalorder %s2289_s12, %s2284_s9 }
  0x7a   : > { %p2287_p12 = pnand %p2286_p9, %p2285_p7  ;;  %p2293_p4 = scmp.lt.u32.totalorder %s2284_s9, %s2647_s27 }
  0x7b   : > { %p2292_p13 = por %p2291_p2, %p2290_p1 }
  0x7c   : > { %p2288_p0 = pneg %p2287_p12 }
  0x7d   : > { %p2294_p8 = por %p2293_p4, %p2292_p13 }
  0x7f   : > { %p2295_p6 = pnand %p2294_p8, %p2288_p0 }
  0x81   : > { %2298 = shalt.err (!%p2295_p6)
}
  0x82   : > { %s2299_s26 = scalar_lea.vmem %s2649_s30, 256  ;;  %s2396_s29 = smov [#allocation2]  }
  0x83   : > { %p2300_p3 = scmp.ne.s32.totalorder %s2649_s30, %s2299_s26  ;;  %s2304_s11 = sshll.u32 %s2396_s29, 4  ;;  %s2305_s11 = int_to_ptr.vmem [resolvable:$false] %s2304_s11 }
  0x84   : > { %s2306_s14 = scalar_lea.vmem %s2305_s11, 512  ;;  %p2307_p12 = scmp.lt.s32.totalorder %s2649_s30, %s2305_s11 }
  0x85   : > { %p2302_p5 = pnand %p2300_p3, %p2286_p9  ;;  %p2308_p1 = scmp.lt.s32.totalorder %s2306_s14, %s2299_s26 }
  0x87   : > { %p2303_p7 = pneg %p2302_p5  ;;  %p2309_p2 = por %p2308_p1, %p2307_p12 }
  0x89   : > { %p2310_p13 = pnand %p2309_p2, %p2303_p7 }
  0x8b   : > { %2313 = shalt.err (!%p2310_p13)
}
  0x8c   : > { %2033 = dma.hbm_to_vmem [thread:$0]  (!%p2651_p11), %s2647_s27, 256, %s2649_s30, %s2655_s28, %s2393_s15, %s2393_s15, %s2394_s16  }
  0x8d   : > { %p3031_p9 = scmp.ne.s32.totalorder %s3025_s25, 0 }
  0x8e   : > { %s2689_s9 = sand.u32 (!%p3031_p9), 1, %s2380_s18   ;;  %p3032_p0 = scmp.ne.s32.totalorder (!%p3031_p9), %s3022_s23, 0 }
  0x8f   : > { %403 = sbr.rel (%p3031_p9) target bundleno = 2023 (0x7e7), region = 64  ;;  %s1731_s12 = sshll.u32 (!%p3031_p9), %s2689_s9, 4 }
  0x90   : > { %s406_s13 = scalar_lea.sflag (!%p3031_p9), [#allocation3], %s2689_s9  ;;  %s409_s8 = scalar_lea.vmem (!%p3031_p9), [#allocation2], %s1731_s12 }
  0x96   : > { %2359 = dma.done.wait (%p3032_p0), %s406_s13, 256  }
  0x97   : > { %2361 = vsyncadd (%p3032_p0), %s406_s13, 4294967040  ;;  %p3033_p11 = scmp.eq.s32.totalorder %s2484_s21, 0 }
  0x99   : > { %2363 = dma.done.wait (%p3033_p11), [#allocation6], 2048   ;;  %p3034_p4 = pmov %p3033_p11 }
  0x9b   : > { %2365 = vsyncadd (%p3034_p4), [#allocation6], 4294965248  ;;  %p3035_p8 = pmov %p3034_p4 }
  0x9c   : > { %p3036_p6 = pmov %p3034_p4 }
  0x9d   : > { %2367 = dma.done.wait (%p3035_p8), [#allocation9], 4096  }
  0x9e   : > { %2369 = vsyncadd (%p3036_p6), [#allocation9], 4294963200  ;;  %v467_v0 = vlaneseq  ;;  %v520_v4 = vld [vmem:[%s409_s8] sm:$0xff]   ;;  %v2713_v5 = vld [vmem:[%s409_s8 + $0x8] sm:$0xff]   ;;  %s2397_s23 = smov 8   ;;  %s2398_s25 = smov 4  }
  0x9f   : > { %v524_v7 = vunpack.c.l.bf16 %v520_v4  ;;  %v525_v8 = vunpack.c.h.bf16 %v520_v4  ;;  %v527_v9 = vunpack.c.h.bf16 %v2713_v5  ;;  %v526_v10 = vunpack.c.l.bf16 %v2713_v5  ;;  %v2112_v11 = vld [vmem:[#allocation5] sm:$0xff]   ;;  %v2113_v12 = vld [vmem:[#allocation5 + $0x8] sm:$0xff]   ;;  %1881 = vmatprep.mubr.bf16.mxu0 %v520_v4  ;;  %v2114_v24 = vld [vmem:[#allocation5 + $0x10] sm:$0xff]   ;;  %s2399_s28 = smov 16   ;;  %s3037_s30 = sld [smem:[#allocation18_spill]] }
  0xa0   : > { %v2707_v1 = vshrl.u32 %v467_v0, 7  ;;  %1865 = vmatprep.subr.bf16.mxu0 %v2112_v11  ;;  %v2115_v30 = vld [vmem:[#allocation5 + $0x18] sm:$0xff]   ;;  %v2116_v37 = vld [vmem:[#allocation5 + $0x20] sm:$0xff]   ;;  %v2117_v38 = vld [vmem:[#allocation5 + $0x28] sm:$0xff]   ;;  %s3038_s29 = sld [smem:[#allocation19_spill]]  ;;  %vm1546_vm9 = vcmask 130048  }
  0xa1   : > { %v702_v13 = vrot.slane %v524_v7, 7  ;;  %v703_v14 = vrot.slane %v525_v8, 7  ;;  %v705_v15 = vrot.slane %v527_v9, 7  ;;  %v2101_v16 = vpack.i.bf16 %v525_v8, %v524_v7  ;;  %1866 = vmatpush3.bf16.msra.mxu0 %v2112_v11  ;;  %v2118_v39 = vld [vmem:[#allocation5 + $0x30] sm:$0xff]   ;;  %v2119_v40 = vld [vmem:[#allocation5 + $0x38] sm:$0xff]   ;;  %v2121_v41 = vld [vmem:[#allocation7] sm:$0xff]  }
  0xa2   : > { %v470_v2 = vadd.s32 16, %v2707_v1  ;;  %v2711_v3 = vand.u32 15, %v2707_v1  ;;  %vm706_vm0 = vcmp.lt.s32.totalorder %v2707_v1, 1  ;;  %v704_v17 = vrot.slane %v526_v10, 7  ;;  %1867 = vmatprep.subr.bf16.mxu0 %v2113_v12  ;;  %v2123_v42 = vld [vmem:[#allocation7 + $0x8] sm:$0xff]   ;;  %v2124_v43 = vld [vmem:[#allocation7 + $0x10] sm:$0xff]  }
  0xa3   : > { %v709_v18 = vsel %vm706_vm0, %v702_v13, %v703_v14  ;;  %v710_v19 = vsel %vm706_vm0, %v705_v15, %v702_v13  ;;  %2102 = vrot.lane.b32.xlu1 %v2101_v16, %s2397_s23  ;;  %v2106_v20 = vpack.i.bf16 %v527_v9, %v526_v10  ;;  %v678_v27 = vrot.slane %v525_v8, 6  ;;  %v2125_v44 = vld [vmem:[#allocation7 + $0x18] sm:$0xff]   ;;  %v2126_v45 = vld [vmem:[#allocation7 + $0x20] sm:$0xff]   ;;  %v2127_v46 = vld [vmem:[#allocation7 + $0x28] sm:$0xff]   ;;  %s463_s11 = scalar_lea.vmem [#allocation11], %s1731_s12  ;;  %s1804_s13 = sshll.u32 %s2484_s21, 8 }
  0xa4   : > { %v2716_v6 = vand.u32 15, %v470_v2  ;;  %vm711_vm1 = vcmp.ge.s32.totalorder %v2711_v3, 1  ;;  %v707_v22 = vsel %vm706_vm0, %v704_v17, %v705_v15  ;;  %v708_v23 = vsel %vm706_vm0, %v703_v14, %v704_v17  ;;  %v2128_v47 = vld [vmem:[#allocation7 + $0x30] sm:$0xff]   ;;  %v2129_v48 = vld [vmem:[#allocation7 + $0x38] sm:$0xff]   ;;  %v2130_v2 = vld [vmem:[#allocation8] sm:$0xff]   ;;  %s1608_s14 = sshll.u32 %s463_s11, 4  ;;  %s2950_s14 = int_to_ptr.vmem [resolvable:$true] %s1608_s14 }
  0xa5   : > { %v723_v21 = vsel %vm711_vm1, %v710_v19, 0.0  ;;  %vm681_vm3 = vcmp.lt.s32.totalorder %v2707_v1, 2  ;;  %1868 = vmatpush3.bf16.msra.mxu0 %v2113_v12  ;;  %v680_v28 = vrot.slane %v527_v9, 6  ;;  %v677_v31 = vrot.slane %v524_v7, 6  ;;  %v2131_v4 = vld [vmem:[#allocation8 + $0x8] sm:$0xff]   ;;  %1905 = vmatprep.subr.bf16.mxu1 %v2130_v2  ;;  %v2133_v7 = vld [vmem:[#allocation8 + $0x18] sm:$0xff]  }
  0xa6   : > { %vm713_vm2 = vcmp.ge.s32.totalorder %v2716_v6, 1  ;;  %v2091_v25 = vpack.i.bf16 %v709_v18, %v723_v21  ;;  %1869 = vmatprep.subr.bf16.mxu0 %v2114_v24  ;;  %v679_v32 = vrot.slane %v526_v10, 6  ;;  %vm686_vm4 = vcmp.ge.s32.totalorder %v2711_v3, 2  ;;  %1906 = vmatpush3.bf16.msra.mxu1 %v2130_v2  ;;  %v2134_v8 = vld [vmem:[#allocation8 + $0x20] sm:$0xff]   ;;  %v2135_v11 = vld [vmem:[#allocation8 + $0x28] sm:$0xff]   ;;  %v2136_v21 = vld [vmem:[#allocation8 + $0x30] sm:$0xff]  }
  0xa7   : > { %v725_v26 = vsel %vm713_vm2, %v708_v23, 0.0  ;;  %2107 = vrot.lane.b32.xlu1 %v2106_v20, %s2397_s23  ;;  %v684_v33 = vsel %vm681_vm3, %v677_v31, %v678_v27  ;;  %v685_v34 = vsel %vm681_vm3, %v680_v28, %v677_v31  ;;  %vm688_vm5 = vcmp.ge.s32.totalorder %v2716_v6, 2  ;;  %1907 = vmatprep.subr.bf16.mxu1 %v2131_v4  ;;  %v1737_v9 = vld [vmem:[%s3002_s2] ss:$0 sm:$0xff]  ;;  %s3039_s15 = sld [smem:[#allocation20_spill]]  ;;  %s1595_s12 = scalar_lea.sflag [#allocation4], %s2689_s9 }
  0xa8   : > { %2092 = vrot.lane.b32.xlu0 %v2091_v25, %s2398_s25  ;;  %v2096_v29 = vpack.i.bf16 %v707_v22, %v725_v26  ;;  %v682_v35 = vsel %vm681_vm3, %v679_v32, %v680_v28  ;;  %v683_v36 = vsel %vm681_vm3, %v678_v27, %v679_v32  ;;  %v698_v51 = vsel %vm686_vm4, %v685_v34, 0.0  ;;  %v1748_v10 = vld [vmem:[%s3004_s4] ss:$0 sm:$0xff]  ;;  %s2314_s21 = scalar_lea.vmem %s2950_s14, 256  ;;  %s2401_s27 = smov [#allocation11]  }
  0xa9   : > { %1870 = vmatpush3.bf16.msra.mxu0 %v2114_v24  ;;  %v700_v55 = vsel %vm688_vm5, %v683_v36, 0.0  ;;  %v1991_v12 = vadd.f32 %v1748_v10, %v1737_v9  ;;  %vm1065_vm6 = vcmp.lt.s32.totalorder %v2707_v1, 4  ;;  %vm1070_vm7 = vcmp.ge.s32.totalorder %v2711_v3, 4  ;;  %v2161_v1 = vld [vmem:[#allocation10 + $0x38] sm:$0xff]   ;;  %p2315_p3 = scmp.ne.s32.totalorder %s2950_s14, %s2314_s21 }
  0xaa   : > { %1871 = vmatprep.subr.bf16.mxu0 %v2115_v30  ;;  %1908 = vmatpush3.bf16.msra.mxu1 %v2131_v4  ;;  %vm1072_vm8 = vcmp.ge.s32.totalorder %v2716_v6, 4  ;;  %v2160_v6 = vld [vmem:[#allocation10 + $0x30] sm:$0xff]  }
  0xab   : > { %p2316_p5 = pnand %p2315_p3, %p2634_p10 }
  0xac   : > { %2097 = vrot.lane.b32.xlu0 %v2096_v29, %s2398_s25 }
  0xad   : > { %1872 = vmatpush3.bf16.msra.mxu0 %v2115_v30  ;;  %v2137_v30 = vld [vmem:[#allocation8 + $0x38] sm:$0xff]   ;;  %s2955_s16 = scalar_lea.hbm %s3039_s15, %s1804_s13  ;;  %p2317_p7 = pneg %p2316_p5 }
  0xae   : > { %1873 = vmatprep.subr.bf16.mxu0 %v2116_v37 }
  0xb1   : > { %1874 = vmatpush3.bf16.msra.mxu0 %v2116_v37 }
  0xb2   : > { %1875 = vmatprep.subr.bf16.mxu0 %v2117_v38 }
  0xb5   : > { %1876 = vmatpush3.bf16.msra.mxu0 %v2117_v38 }
  0xb6   : > { %1877 = vmatprep.subr.bf16.mxu0 %v2118_v39 }
  0xb9   : > { %1878 = vmatpush3.bf16.msra.mxu0 %v2118_v39 }
  0xba   : > { %1879 = vmatprep.subr.bf16.mxu0 %v2119_v40 }
  0xbd   : > { %1880 = vmatpush3.bf16.msra.mxu0 %v2119_v40 }
  0xbe   : > { %1885 = vmatprep.subr.bf16.mxu0 %v2121_v41 }
  0xc0   : > { %1882 = vmatmul.mubr.bf16.vlgmr.msra.gmra.mrb[0].mxu0 %v2713_v5  ;;  %v2132_v5 = vld [vmem:[#allocation8 + $0x10] sm:$0xff]  }
  0xc1   : > { %1886 = vmatpush3.bf16.msra.mxu0 %v2121_v41  ;;  %1909 = vmatprep.subr.bf16.mxu1 %v2132_v5 }
  0xc2   : > { %1887 = vmatprep.subr.bf16.mxu0 %v2123_v42  ;;  %1910 = vmatpush3.bf16.msra.mxu1 %v2132_v5  ;;  %v2138_v5 = vld [vmem:[#allocation8 + $0x40] sm:$0xff]  }
  0xc3   : > { %1911 = vmatprep.subr.bf16.mxu1 %v2133_v7 }
  0xc5   : > { %1888 = vmatpush3.bf16.msra.mxu0 %v2123_v42 }
  0xc6   : > { %1889 = vmatprep.subr.bf16.mxu0 %v2124_v43  ;;  %1912 = vmatpush3.bf16.msra.mxu1 %v2133_v7  ;;  %v2139_v7 = vld [vmem:[#allocation8 + $0x48] sm:$0xff]  }
  0xc7   : > { %1913 = vmatprep.subr.bf16.mxu1 %v2134_v8 }
  0xc9   : > { %1890 = vmatpush3.bf16.msra.mxu0 %v2124_v43 }
  0xca   : > { %1891 = vmatprep.subr.bf16.mxu0 %v2125_v44  ;;  %1914 = vmatpush3.bf16.msra.mxu1 %v2134_v8  ;;  %v2140_v8 = vld [vmem:[#allocation8 + $0x50] sm:$0xff]  }
  0xcb   : > { %1915 = vmatprep.subr.bf16.mxu1 %v2135_v11 }
  0xcd   : > { %1892 = vmatpush3.bf16.msra.mxu0 %v2125_v44 }
  0xce   : > { %1893 = vmatprep.subr.bf16.mxu0 %v2126_v45  ;;  %1916 = vmatpush3.bf16.msra.mxu1 %v2135_v11  ;;  %v1757_v11 = vld [vmem:[%s3006_s6] ss:$0 sm:$0xff] }
  0xcf   : > { %1917 = vmatprep.subr.bf16.mxu1 %v2136_v21 }
  0xd1   : > { %1894 = vmatpush3.bf16.msra.mxu0 %v2126_v45 }
  0xd2   : > { %1895 = vmatprep.subr.bf16.mxu0 %v2127_v46  ;;  %1918 = vmatpush3.bf16.msra.mxu1 %v2136_v21 }
  0xd3   : > { %1919 = vmatprep.subr.bf16.mxu1 %v2137_v30 }
  0xd5   : > { %1896 = vmatpush3.bf16.msra.mxu0 %v2127_v46 }
  0xd6   : > { %1897 = vmatprep.subr.bf16.mxu0 %v2128_v47  ;;  %1920 = vmatpush3.bf16.msra.mxu1 %v2137_v30 }
  0xd7   : > { %1925 = vmatprep.subr.bf16.mxu1 %v2138_v5 }
  0xd9   : > { %1898 = vmatpush3.bf16.msra.mxu0 %v2128_v47 }
  0xda   : > { %1899 = vmatprep.subr.bf16.mxu0 %v2129_v48 }
  0xdd   : > { %1900 = vmatpush3.bf16.msra.mxu0 %v2129_v48 }
 0x115   : > { %v2103_v49 = vpop.permute.xlu1 %2102 }
 0x119   : > { %v2108_v52 = vpop.permute.xlu1 %2107 }
 0x11a   : > { %v2093_v50 = vpop.permute.xlu0 %2092 }
 0x11b   : > { %v2164_v53 = vadd.low.f32.bf16 %v698_v51, %v2093_v50  ;;  %v2165_v54 = vadd.high.f32.bf16 %v684_v33, %v2093_v50 }
 0x11d   : > { %v2166_v57 = vadd.low.f32.bf16 %v2164_v53, %v2103_v49  ;;  %v2167_v58 = vadd.high.f32.bf16 %v2165_v54, %v2103_v49 }
 0x11e   : > { %v2098_v56 = vpop.permute.xlu0 %2097 }
 0x11f   : > { %v2168_v59 = vadd.high.f32.bf16 %v682_v35, %v2098_v56  ;;  %v2169_v60 = vadd.low.f32.bf16 %v700_v55, %v2098_v56  ;;  %v751_v61 = vpack.c.bf16 %v2167_v58, %v2166_v57 }
 0x121   : > { %v2170_v62 = vadd.low.f32.bf16 %v2169_v60, %v2108_v52  ;;  %v2171_v63 = vadd.high.f32.bf16 %v2168_v59, %v2108_v52  ;;  %1901 = vmatprep.mubr.bf16.mxu0 %v751_v61 }
 0x123   : > { %v752_v0 = vpack.c.bf16 %v2171_v63, %v2170_v62 }
 0x125   : > { %1902 = vmatmul.mubr.bf16.vlgmr.msra.gmra.mrb[0].mxu0 %v752_v0 }
 0x1f8   : > { %v1903_v13 = vpop.f32.mrb[0].mxu0 }
 0x1f9   : > { %v1985_v14 = vadd.f32 %v1903_v13, %v1737_v9  ;;  %v841_v15 = vpop.f32.mrb[1].mxu0 }
 0x1fa   : > { %v1987_v16 = vadd.f32 %v1737_v9, %v841_v15  ;;  %v1904_v17 = vpop.f32.mrb[2].mxu0  ;;  %v2141_v9 = vld [vmem:[#allocation8 + $0x58] sm:$0xff]   ;;  %v2143_v15 = vld [vmem:[#allocation8 + $0x68] sm:$0xff]  }
 0x1fb   : > { %v1986_v18 = vadd.f32 %v1985_v14, %v1748_v10  ;;  %v1990_v19 = vadd.f32 %v1991_v12, %v1904_v17  ;;  %v844_v20 = vpop.f32.mrb[3].mxu0 }
 0x1fc   : > { %v1988_v22 = vadd.f32 %v1987_v16, %v1748_v10  ;;  %v1992_v23 = vadd.f32 %v1991_v12, %v844_v20  ;;  %v2142_v10 = vld [vmem:[#allocation8 + $0x60] sm:$0xff]  }
 0x1fd   : > { %v2758_v24 = vmax.f32 %v1986_v18, 0.0  ;;  %v2760_v25 = vmax.f32 %v1990_v19, 0.0 }
 0x1fe   : > { %v2762_v26 = vmax.f32 %v1988_v22, 0.0  ;;  %v2764_v27 = vmax.f32 %v1992_v23, 0.0 }
 0x1ff   : > { %v896_v28 = vrot.slane %v2760_v25, 7  ;;  %v895_v29 = vrot.slane %v2758_v24, 7  ;;  %v884_v40 = vrot.slane %v2760_v25, 6  ;;  %v883_v44 = vrot.slane %v2758_v24, 6 }
 0x200   : > { %917 = vrot.lane.b32.xlu0 %v2762_v26, %s2399_s28  ;;  %919 = vrot.lane.b32.xlu1 %v2764_v27, %s2399_s28  ;;  %v893_v31 = vrot.slane %v2762_v26, 7  ;;  %v894_v32 = vrot.slane %v2764_v27, 7  ;;  %v881_v39 = vrot.slane %v2762_v26, 6  ;;  %v882_v45 = vrot.slane %v2764_v27, 6 }
 0x201   : > { %v897_v35 = vsel %vm706_vm0, %v895_v29, %v896_v28  ;;  %v885_v55 = vsel %vm681_vm3, %v883_v44, %v884_v40 }
 0x202   : > { %v900_v33 = vsel %vm706_vm0, %v896_v28, %v893_v31  ;;  %v898_v36 = vsel %vm706_vm0, %v894_v32, %v895_v29  ;;  %v899_v37 = vsel %vm706_vm0, %v893_v31, %v894_v32  ;;  %v888_v43 = vsel %vm681_vm3, %v884_v40, %v881_v39  ;;  %v2144_v28 = vld [vmem:[#allocation8 + $0x70] sm:$0xff]  }
 0x203   : > { %v901_v34 = vsel %vm711_vm1, %v900_v33, 0.0  ;;  %v903_v38 = vsel %vm713_vm2, %v898_v36, 0.0  ;;  %v889_v48 = vsel %vm686_vm4, %v888_v43, 0.0  ;;  %v886_v50 = vsel %vm681_vm3, %v882_v45, %v883_v44  ;;  %v2145_v33 = vld [vmem:[#allocation8 + $0x78] sm:$0xff]  }
 0x204   : > { %905 = vrot.lane.b32.xlu0 %v901_v34, %s2397_s23  ;;  %911 = vrot.lane.b32.xlu1 %v897_v35, %s2397_s23  ;;  %v887_v52 = vsel %vm681_vm3, %v881_v39, %v882_v45  ;;  %v891_v56 = vsel %vm688_vm5, %v886_v50, 0.0 }
 0x208   : > { %907 = vrot.lane.b32.xlu1 %v899_v37, %s2397_s23  ;;  %909 = vrot.lane.b32.xlu0 %v903_v38, %s2397_s23 }
 0x20c   : > { %923 = vrot.lane.b32.xlu1 %v2760_v25, %s2399_s28  ;;  %921 = vrot.lane.b32.xlu0 %v2758_v24, %s2399_s28 }
 0x272   : > { %v918_v41 = vpop.permute.xlu0 %917  ;;  %v920_v42 = vpop.permute.xlu1 %919 }
 0x276   : > { %v906_v46 = vpop.permute.xlu0 %905  ;;  %v912_v47 = vpop.permute.xlu1 %911 }
 0x277   : > { %v913_v49 = vadd.f32 %v906_v46, %v889_v48  ;;  %v916_v57 = vadd.f32 %v912_v47, %v885_v55 }
 0x279   : > { %v925_v59 = vadd.f32 %v918_v41, %v913_v49 }
 0x27a   : > { %v908_v51 = vpop.permute.xlu1 %907  ;;  %v910_v53 = vpop.permute.xlu0 %909 }
 0x27b   : > { %v914_v54 = vadd.f32 %v908_v51, %v887_v52  ;;  %v915_v58 = vadd.f32 %v910_v53, %v891_v56 }
 0x27d   : > { %v926_v60 = vadd.f32 %v920_v42, %v914_v54 }
 0x27e   : > { %v924_v61 = vpop.permute.xlu1 %923  ;;  %v922_v62 = vpop.permute.xlu0 %921 }
 0x27f   : > { %v928_v63 = vadd.f32 %v924_v61, %v916_v57  ;;  %v927_v0 = vadd.f32 %v922_v62, %v915_v58  ;;  %v929_v2 = vpack.c.bf16 %v926_v60, %v925_v59 }
 0x281   : > { %v930_v4 = vpack.c.bf16 %v928_v63, %v927_v0  ;;  %1921 = vmatprep.mubr.bf16.mxu1 %v929_v2 }
 0x283   : > { %1922 = vmatmul.mubr.bf16.vlgmr.msra.gmra.mrb[0].mxu1 %v930_v4 }
 0x284   : > { %1926 = vmatpush3.bf16.msra.mxu1 %v2138_v5 }
 0x285   : > { %1927 = vmatprep.subr.bf16.mxu1 %v2139_v7 }
 0x288   : > { %1928 = vmatpush3.bf16.msra.mxu1 %v2139_v7 }
 0x289   : > { %1929 = vmatprep.subr.bf16.mxu1 %v2140_v8 }
 0x28c   : > { %1930 = vmatpush3.bf16.msra.mxu1 %v2140_v8  ;;  %v2146_v8 = vld [vmem:[#allocation8 + $0x80] sm:$0xff]  }
 0x28d   : > { %1931 = vmatprep.subr.bf16.mxu1 %v2141_v9  ;;  %1945 = vmatprep.subr.bf16.mxu0 %v2146_v8 }
 0x28e   : > { %1946 = vmatpush3.bf16.msra.mxu0 %v2146_v8 }
 0x290   : > { %1932 = vmatpush3.bf16.msra.mxu1 %v2141_v9  ;;  %v2147_v9 = vld [vmem:[#allocation8 + $0x88] sm:$0xff]  }
 0x291   : > { %1933 = vmatprep.subr.bf16.mxu1 %v2142_v10  ;;  %1947 = vmatprep.subr.bf16.mxu0 %v2147_v9 }
 0x292   : > { %1948 = vmatpush3.bf16.msra.mxu0 %v2147_v9 }
 0x294   : > { %1934 = vmatpush3.bf16.msra.mxu1 %v2142_v10  ;;  %v2148_v10 = vld [vmem:[#allocation8 + $0x90] sm:$0xff]  }
 0x295   : > { %1935 = vmatprep.subr.bf16.mxu1 %v2143_v15  ;;  %1949 = vmatprep.subr.bf16.mxu0 %v2148_v10 }
 0x296   : > { %1950 = vmatpush3.bf16.msra.mxu0 %v2148_v10 }
 0x298   : > { %1936 = vmatpush3.bf16.msra.mxu1 %v2143_v15 }
 0x299   : > { %1937 = vmatprep.subr.bf16.mxu1 %v2144_v28 }
 0x29c   : > { %1938 = vmatpush3.bf16.msra.mxu1 %v2144_v28 }
 0x29d   : > { %1939 = vmatprep.subr.bf16.mxu1 %v2145_v33 }
 0x2a0   : > { %1940 = vmatpush3.bf16.msra.mxu1 %v2145_v33 }
 0x356   : > { %v1923_v12 = vpop.f32.mrb[0].mxu1 }
 0x357   : > { %v1028_v13 = vadd.f32 %v1923_v12, %v1757_v11  ;;  %v1019_v14 = vpop.f32.mrb[1].mxu1  ;;  %v2150_v12 = vld [vmem:[#allocation8 + $0xa0] sm:$0xff]  }
 0x358   : > { %v1020_v16 = vadd.f32 %v1757_v11, %v1019_v14  ;;  %v1924_v17 = vpop.f32.mrb[2].mxu1 }
 0x359   : > { %v1036_v18 = vadd.f32 %v1028_v13, %v2758_v24  ;;  %v1031_v19 = vadd.f32 %v1924_v17, %v1757_v11  ;;  %v1022_v20 = vpop.f32.mrb[3].mxu1  ;;  %v1767_v13 = vld [vmem:[%s3006_s6 + $0x1] ss:$0 sm:$0xff]  ;;  %v2151_v17 = vld [vmem:[#allocation8 + $0xa8] sm:$0xff]  }
 0x35a   : > { %v1034_v21 = vadd.f32 %v1020_v16, %v2762_v26  ;;  %v1023_v22 = vadd.f32 %v1757_v11, %v1022_v20  ;;  %v2149_v11 = vld [vmem:[#allocation8 + $0x98] sm:$0xff]  }
 0x35b   : > { %v1037_v23 = vadd.f32 %v1031_v19, %v2760_v25  ;;  %v2819_v31 = vmax.f32 %v1036_v18, 0.0  ;;  %1951 = vmatprep.subr.bf16.mxu0 %v2149_v11 }
 0x35c   : > { %v2816_v29 = vmax.f32 %v1034_v21, 0.0  ;;  %v1035_v30 = vadd.f32 %v1023_v22, %v2764_v27  ;;  %1952 = vmatpush3.bf16.msra.mxu0 %v2149_v11 }
 0x35d   : > { %v2821_v32 = vmax.f32 %v1037_v23, 0.0  ;;  %v1088_v35 = vrot.slane %v2819_v31, 6  ;;  %v1063_v48 = vrot.slane %v2819_v31, 4  ;;  %1953 = vmatprep.subr.bf16.mxu0 %v2150_v12 }
 0x35e   : > { %v2823_v24 = vmax.f32 %v1035_v30, 0.0  ;;  %1110 = vrot.lane.b32.xlu0 %v2816_v29, %s2399_s28  ;;  %v1086_v26 = vrot.slane %v2816_v29, 6  ;;  %v1061_v43 = vrot.slane %v2816_v29, 4 }
 0x35f   : > { %v1089_v25 = vrot.slane %v2821_v32, 6  ;;  %v1064_v42 = vrot.slane %v2821_v32, 4 }
 0x360   : > { %1112 = vrot.lane.b32.xlu1 %v2823_v24, %s2399_s28  ;;  %v1087_v27 = vrot.slane %v2823_v24, 6  ;;  %v1062_v45 = vrot.slane %v2823_v24, 4  ;;  %1954 = vmatpush3.bf16.msra.mxu0 %v2150_v12 }
 0x361   : > { %v1093_v34 = vsel %vm681_vm3, %v1089_v25, %v1086_v26  ;;  %v1090_v37 = vsel %vm681_vm3, %v1088_v35, %v1089_v25  ;;  %v1069_v47 = vsel %vm1065_vm6, %v1064_v42, %v1061_v43  ;;  %v1066_v58 = vsel %vm1065_vm6, %v1063_v48, %v1064_v42  ;;  %1955 = vmatprep.subr.bf16.mxu0 %v2151_v17  ;;  %v2155_v42 = vld [vmem:[#allocation10 + $0x8] sm:$0xff]  }
 0x362   : > { %v1094_v36 = vsel %vm686_vm4, %v1093_v34, 0.0  ;;  %v1091_v38 = vsel %vm681_vm3, %v1087_v27, %v1088_v35  ;;  %v1092_v40 = vsel %vm681_vm3, %v1086_v26, %v1087_v27  ;;  %v1082_v50 = vsel %vm1070_vm7, %v1069_v47, 0.0  ;;  %v2152_v26 = vld [vmem:[#allocation8 + $0xb0] sm:$0xff]   ;;  %v2153_v35 = vld [vmem:[#allocation8 + $0xb8] sm:$0xff]   ;;  %v2158_v47 = vld [vmem:[#allocation10 + $0x20] sm:$0xff]  }
 0x363   : > { %1098 = vrot.lane.b32.xlu0 %v1094_v36, %s2397_s23  ;;  %v1096_v39 = vsel %vm688_vm5, %v1091_v38, 0.0  ;;  %v1067_v51 = vsel %vm1065_vm6, %v1062_v45, %v1063_v48  ;;  %v1068_v55 = vsel %vm1065_vm6, %v1061_v43, %v1062_v45  ;;  %v2156_v45 = vld [vmem:[#allocation10 + $0x10] sm:$0xff]  }
 0x364   : > { %1104 = vrot.lane.b32.xlu1 %v1090_v37, %s2397_s23  ;;  %v1084_v56 = vsel %vm1072_vm8, %v1067_v51, 0.0  ;;  %1956 = vmatpush3.bf16.msra.mxu0 %v2151_v17 }
 0x365   : > { %1957 = vmatprep.subr.bf16.mxu0 %v2152_v26 }
 0x367   : > { %1102 = vrot.lane.b32.xlu0 %v1096_v39, %s2397_s23 }
 0x368   : > { %1100 = vrot.lane.b32.xlu1 %v1092_v40, %s2397_s23  ;;  %1958 = vmatpush3.bf16.msra.mxu0 %v2152_v26 }
 0x369   : > { %1959 = vmatprep.subr.bf16.mxu0 %v2153_v35 }
 0x36b   : > { %1114 = vrot.lane.b32.xlu0 %v2819_v31, %s2399_s28 }
 0x36c   : > { %1116 = vrot.lane.b32.xlu1 %v2821_v32, %s2399_s28  ;;  %1960 = vmatpush3.bf16.msra.mxu0 %v2153_v35 }
 0x3d0   : > { %v1111_v41 = vpop.permute.xlu0 %1110 }
 0x3d2   : > { %v1113_v44 = vpop.permute.xlu1 %1112 }
 0x3d5   : > { %v1099_v46 = vpop.permute.xlu0 %1098 }
 0x3d6   : > { %v1105_v49 = vpop.permute.xlu1 %1104  ;;  %v1106_v52 = vadd.f32 %v1099_v46, %v1082_v50  ;;  %v2157_v46 = vld [vmem:[#allocation10 + $0x18] sm:$0xff]  }
 0x3d7   : > { %v1109_v61 = vadd.f32 %v1105_v49, %v1066_v58 }
 0x3d8   : > { %v1118_v60 = vadd.f32 %v1111_v41, %v1106_v52  ;;  %v2154_v41 = vld [vmem:[#allocation10] sm:$0xff]  }
 0x3d9   : > { %v1103_v53 = vpop.permute.xlu0 %1102  ;;  %1965 = vmatprep.subr.bf16.mxu1 %v2154_v41 }
 0x3da   : > { %v1101_v54 = vpop.permute.xlu1 %1100  ;;  %v1108_v59 = vadd.f32 %v1103_v53, %v1084_v56 }
 0x3db   : > { %v1107_v57 = vadd.f32 %v1101_v54, %v1068_v55 }
 0x3dd   : > { %v1119_v62 = vadd.f32 %v1113_v44, %v1107_v57  ;;  %v1115_v63 = vpop.permute.xlu0 %1114 }
 0x3de   : > { %v1120_v0 = vadd.f32 %v1115_v63, %v1108_v59  ;;  %v1117_v2 = vpop.permute.xlu1 %1116 }
 0x3df   : > { %v1121_v4 = vadd.f32 %v1117_v2, %v1109_v61  ;;  %v1122_v5 = vpack.c.bf16 %v1119_v62, %v1118_v60 }
 0x3e1   : > { %v1123_v7 = vpack.c.bf16 %v1121_v4, %v1120_v0  ;;  %1941 = vmatprep.mubr.bf16.mxu1 %v1122_v5 }
 0x3e3   : > { %1942 = vmatmul.mubr.bf16.vlgmr.msra.gmra.mrb[4].mxu1 %v1123_v7 }
 0x3e4   : > { %1966 = vmatpush3.bf16.msra.mxu1 %v2154_v41 }
 0x3e5   : > { %1967 = vmatprep.subr.bf16.mxu1 %v2155_v42 }
 0x3e8   : > { %1968 = vmatpush3.bf16.msra.mxu1 %v2155_v42 }
 0x3e9   : > { %1969 = vmatprep.subr.bf16.mxu1 %v2156_v45 }
 0x3ec   : > { %1970 = vmatpush3.bf16.msra.mxu1 %v2156_v45 }
 0x3ed   : > { %1971 = vmatprep.subr.bf16.mxu1 %v2157_v46 }
 0x3f0   : > { %1972 = vmatpush3.bf16.msra.mxu1 %v2157_v46 }
 0x3f1   : > { %1973 = vmatprep.subr.bf16.mxu1 %v2158_v47 }
 0x3f4   : > { %1974 = vmatpush3.bf16.msra.mxu1 %v2158_v47  ;;  %v1539_v47 = vld [vmem:[%s3038_s29] sm:$0xf] }
 0x4b6   : > { %v1943_v14 = vpop.f32.mrb[4].mxu1 }
 0x4b7   : > { %v1221_v15 = vadd.f32 %v1943_v14, %v1767_v13  ;;  %v1212_v16 = vpop.f32.mrb[5].mxu1  ;;  %v2159_v14 = vld [vmem:[#allocation10 + $0x28] sm:$0xff]  }
 0x4b8   : > { %v1213_v18 = vadd.f32 %v1767_v13, %v1212_v16  ;;  %v1944_v19 = vpop.f32.mrb[6].mxu1  ;;  %1975 = vmatprep.subr.bf16.mxu1 %v2159_v14 }
 0x4b9   : > { %v1229_v20 = vadd.f32 %v1221_v15, %v2819_v31  ;;  %v1224_v21 = vadd.f32 %v1944_v19, %v1767_v13  ;;  %v1215_v22 = vpop.f32.mrb[7].mxu1  ;;  %1976 = vmatpush3.bf16.msra.mxu1 %v2159_v14  ;;  %v1777_v15 = vld [vmem:[%s3006_s6 + $0x2] ss:$0 sm:$0xff] }
 0x4ba   : > { %v1227_v23 = vadd.f32 %v1213_v18, %v2816_v29  ;;  %v1216_v28 = vadd.f32 %v1767_v13, %v1215_v22  ;;  %1977 = vmatprep.subr.bf16.mxu1 %v2160_v6 }
 0x4bb   : > { %v1230_v30 = vadd.f32 %v1224_v21, %v2821_v32  ;;  %v2881_v27 = vmax.f32 %v1229_v20, 0.0 }
 0x4bc   : > { %v2878_v25 = vmax.f32 %v1227_v23, 0.0  ;;  %v1228_v33 = vadd.f32 %v1216_v28, %v2823_v24 }
 0x4bd   : > { %v2883_v34 = vmax.f32 %v1230_v30, 0.0  ;;  %v1268_v37 = vrot.slane %v2881_v27, 6  ;;  %v1256_v55 = vrot.slane %v2881_v27, 4  ;;  %1978 = vmatpush3.bf16.msra.mxu1 %v2160_v6 }
 0x4be   : > { %v2885_v31 = vmax.f32 %v1228_v33, 0.0  ;;  %1290 = vrot.lane.b32.xlu0 %v2878_v25, %s2399_s28  ;;  %v1266_v29 = vrot.slane %v2878_v25, 6  ;;  %v1254_v50 = vrot.slane %v2878_v25, 4  ;;  %1979 = vmatprep.subr.bf16.mxu1 %v2161_v1 }
 0x4bf   : > { %v1269_v32 = vrot.slane %v2883_v34, 6  ;;  %v1257_v49 = vrot.slane %v2883_v34, 4 }
 0x4c0   : > { %1292 = vrot.lane.b32.xlu1 %v2885_v31, %s2399_s28  ;;  %v1267_v24 = vrot.slane %v2885_v31, 6  ;;  %v1255_v52 = vrot.slane %v2885_v31, 4 }
 0x4c1   : > { %v1273_v36 = vsel %vm681_vm3, %v1269_v32, %v1266_v29  ;;  %v1270_v39 = vsel %vm681_vm3, %v1268_v37, %v1269_v32  ;;  %v1261_v54 = vsel %vm1065_vm6, %v1257_v49, %v1254_v50  ;;  %v1258_v2 = vsel %vm1065_vm6, %v1256_v55, %v1257_v49  ;;  %1980 = vmatpush3.bf16.msra.mxu1 %v2161_v1 }
 0x4c2   : > { %v1274_v38 = vsel %vm686_vm4, %v1273_v36, 0.0  ;;  %v1271_v40 = vsel %vm681_vm3, %v1267_v24, %v1268_v37  ;;  %v1272_v44 = vsel %vm681_vm3, %v1266_v29, %v1267_v24  ;;  %v1262_v57 = vsel %vm1070_vm7, %v1261_v54, 0.0 }
 0x4c3   : > { %1278 = vrot.lane.b32.xlu0 %v1274_v38, %s2397_s23  ;;  %v1276_v43 = vsel %vm688_vm5, %v1271_v40, 0.0  ;;  %v1259_v58 = vsel %vm1065_vm6, %v1255_v52, %v1256_v55  ;;  %v1260_v62 = vsel %vm1065_vm6, %v1254_v50, %v1255_v52  ;;  %v2400_v38 = vmov 0  }
 0x4c4   : > { %1284 = vrot.lane.b32.xlu1 %v1270_v39, %s2397_s23  ;;  %v1264_v63 = vsel %vm1072_vm8, %v1259_v58, 0.0  ;;  %2111 = vset.pattern.permute.xlu0 %v2400_v38 }
 0x4c7   : > { %1282 = vrot.lane.b32.xlu0 %v1276_v43, %s2397_s23 }
 0x4c8   : > { %1280 = vrot.lane.b32.xlu1 %v1272_v44, %s2397_s23 }
 0x4cb   : > { %1294 = vrot.lane.b32.xlu0 %v2881_v27, %s2399_s28 }
 0x4cc   : > { %1296 = vrot.lane.b32.xlu1 %v2883_v34, %s2399_s28 }
 0x530   : > { %v1291_v48 = vpop.permute.xlu0 %1290 }
 0x532   : > { %v1293_v51 = vpop.permute.xlu1 %1292 }
 0x535   : > { %v1279_v53 = vpop.permute.xlu0 %1278 }
 0x536   : > { %v1285_v56 = vpop.permute.xlu1 %1284  ;;  %v1286_v59 = vadd.f32 %v1279_v53, %v1262_v57 }
 0x537   : > { %v1289_v3 = vadd.f32 %v1285_v56, %v1258_v2 }
 0x538   : > { %v1298_v5 = vadd.f32 %v1291_v48, %v1286_v59 }
 0x539   : > { %v1283_v60 = vpop.permute.xlu0 %1282 }
 0x53a   : > { %v1281_v61 = vpop.permute.xlu1 %1280  ;;  %v1288_v4 = vadd.f32 %v1283_v60, %v1264_v63 }
 0x53b   : > { %v1287_v0 = vadd.f32 %v1281_v61, %v1260_v62 }
 0x53d   : > { %v1299_v7 = vadd.f32 %v1293_v51, %v1287_v0  ;;  %v1295_v8 = vpop.permute.xlu0 %1294 }
 0x53e   : > { %v1300_v9 = vadd.f32 %v1295_v8, %v1288_v4  ;;  %v1297_v10 = vpop.permute.xlu1 %1296 }
 0x53f   : > { %v1301_v11 = vadd.f32 %v1297_v10, %v1289_v3  ;;  %v1302_v12 = vpack.c.bf16 %v1299_v7, %v1298_v5 }
 0x541   : > { %v1303_v13 = vpack.c.bf16 %v1301_v11, %v1300_v9  ;;  %1961 = vmatprep.mubr.bf16.mxu0 %v1302_v12 }
 0x543   : > { %1962 = vmatmul.mubr.bf16.vlgmr.msra.gmra.mrb[4].mxu0 %v1303_v13 }
 0x544   : > { %1582 = vmatprep.mubr.bf16.mxu0 %v2400_v38 }
 0x616   : > { %v1963_v16 = vpop.f32.mrb[4].mxu0 }
 0x617   : > { %v1401_v17 = vadd.f32 %v1963_v16, %v1777_v15  ;;  %v1392_v18 = vpop.f32.mrb[5].mxu0 }
 0x618   : > { %v1393_v19 = vadd.f32 %v1777_v15, %v1392_v18  ;;  %v1964_v20 = vpop.f32.mrb[6].mxu0 }
 0x619   : > { %v1409_v21 = vadd.f32 %v1401_v17, %v2881_v27  ;;  %v1404_v22 = vadd.f32 %v1964_v20, %v1777_v15  ;;  %v1395_v23 = vpop.f32.mrb[7].mxu0 }
 0x61a   : > { %v1407_v28 = vadd.f32 %v1393_v19, %v2878_v25  ;;  %v1396_v30 = vadd.f32 %v1777_v15, %v1395_v23  ;;  %v1540_v25 = vld [vmem:[%s3010_s10] sm:$0xff] }
 0x61b   : > { %v1410_v26 = vadd.f32 %v1404_v22, %v2883_v34  ;;  %v1413_v29 = vmax.f32 %v1409_v21, 0.0  ;;  %1543 = vperm.xlu0 %2111, %v1540_v25   ;;  %v1786_v34 = vld [vmem:[%s3037_s30] ss:$0 sm:$0xff]  ;;  %s2318_s30 = sshll.u32 %s2401_s27, 4  ;;  %s2319_s30 = int_to_ptr.vmem [resolvable:$false] %s2318_s30 }
 0x61c   : > { %v1408_v33 = vadd.f32 %v1396_v30, %v2885_v31  ;;  %v1411_v35 = vmax.f32 %v1407_v28, 0.0  ;;  %s2320_s28 = scalar_lea.vmem %s2319_s30, 512  ;;  %p2321_p12 = scmp.lt.s32.totalorder %s2950_s14, %s2319_s30 }
 0x61d   : > { %v1414_v32 = vmax.f32 %v1410_v26, 0.0  ;;  %p2322_p1 = scmp.lt.s32.totalorder %s2320_s28, %s2314_s21 }
 0x61e   : > { %v1412_v24 = vmax.f32 %v1408_v33, 0.0 }
 0x61f   : > { %v1416_v36 = vpack.c.bf16 %v1414_v32, %v1413_v29  ;;  %p2323_p2 = por %p2322_p1, %p2321_p12 }
 0x620   : > { %v1415_v37 = vpack.c.bf16 %v1412_v24, %v1411_v35 }
 0x621   : > { %p2324_p13 = pnand %p2323_p2, %p2317_p7 }
 0x622   : > { %1981 = vmatprep.mubr.bf16.mxu1 %v1415_v37 }
 0x623   : > { %1982 = vmatmul.mubr.bf16.vlgmr.msra.gmra.mrb[8].mxu1 %v1416_v36 }
 0x69a   : > { %v1544_v48 = vpop.permute.xlu0 %1543 }
 0x6f6   : > { %v1983_v27 = vpop.f32.mrb[8].mxu1 }
 0x6f7   : > { %v1522_v31 = vpop.f32.mrb[9].mxu1  ;;  %v1531_v40 = vadd.f32 %v1983_v27, %v1786_v34 }
 0x6f8   : > { %v1984_v39 = vpop.f32.mrb[10].mxu1  ;;  %v1523_v43 = vadd.f32 %v1786_v34, %v1522_v31 }
 0x6f9   : > { %v1534_v41 = vadd.f32 %v1984_v39, %v1786_v34  ;;  %v1525_v42 = vpop.f32.mrb[11].mxu1 }
 0x6fa   : > { %v1526_v44 = vadd.f32 %v1786_v34, %v1525_v42 }
 0x6fb   : > { %v1538_v45 = vpack.c.bf16 %v1534_v41, %v1531_v40 }
 0x6fc   : > { %v1537_v46 = vpack.c.bf16 %v1526_v44, %v1523_v43 }
 0x6fd   : > { %1550 = vmatprep.subr.bf16.mxu0 %v1538_v45 }
 0x6fe   : > { %1551 = vmatpush1.bf16.msra.mxu0 %v1537_v46 }
 0x701   : > { %1795 = vmatmul.mubr.msk.bf16.vlgmr.msra.gmra.mrb[8].mxu0 %vm1546_vm9, %v1539_v47 }
 0x7d4   : > { %v1584_v49 = vpop.f32.mrb[8].mxu0 }
 0x7d5   : > { %v1586_v50 = vpop.f32.mrb[9].mxu0  ;;  %v1585_v51 = vadd.f32 %v1584_v49, %v1544_v48 }
 0x7d6   : > { %v1588_v52 = vpop.f32.mrb[10].mxu0  ;;  %v1587_v53 = vadd.f32 %v1586_v50, %v1544_v48 }
 0x7d7   : > { %1591 = vst [vmem:[%s463_s11] sm:$0xff] %v1585_v51  ;;  %v1589_v54 = vpop.f32.mrb[11].mxu0 }
 0x7d8   : > { %1796 = vst [vmem:[%s463_s11 + $0x8] sm:$0xff] %v1587_v53 }
 0x7d9   : > { %2327 = shalt.err (!%p2324_p13)
}
 0x7da   : > { %s2328_s26 = scalar_lea.hbm %s2955_s16, 256  ;;  %s2332_s13 = scalar_lea.hbm %s3039_s15, 512 }
 0x7db   : > { %p2329_p9 = scmp.ne.s32.totalorder %s2955_s16, %s2328_s26  ;;  %p2333_p4 = scmp.lt.u32.totalorder %s2955_s16, %s3039_s15 }
 0x7dc   : > { %p2334_p8 = scmp.lt.u32.totalorder %s2332_s13, %s2328_s26  ;;  %p2336_p3 = scmp.lt.u32.totalorder %s2328_s26, %s2955_s16 }
 0x7dd   : > { %p2330_p0 = pnand %p2329_p9, %p2634_p10 }
 0x7de   : > { %p2335_p6 = por %p2334_p8, %p2333_p4 }
 0x7df   : > { %p2331_p11 = pneg %p2330_p0 }
 0x7e0   : > { %p2337_p5 = por %p2336_p3, %p2335_p6 }
 0x7e2   : > { %p2338_p7 = pnand %p2337_p5, %p2331_p11 }
 0x7e4   : > { %2341 = shalt.err (!%p2338_p7)
}
 0x7e5   : > { %s2402_s21 = smov 128  }
 0x7e6   : > { %2015 = dma.vmem_to_hbm [thread:$0]  (%p2634_p10), %s2950_s14, 256, %s2955_s16, %s1595_s12, %s2402_s21, %s2402_s21, %s2397_s23  }
 0x7e7 PF: > { %s3040_s27 = sld [smem:[#allocation16_spill]]  ;;  %s3041_s30 = sld [smem:[#allocation17_spill]] }
 0x7e8   : > { %p3043_p1 = scmp.ge.s32.totalorder %s2388_s20, 2 }
 0x7ed   : > { %s1623_s28 = sand.u32 1, %s3040_s27   ;;  %p3042_p12 = scmp.ne.s32.totalorder %s3041_s30, 0 }
 0x7ee   : > { %s1624_s26 = scalar_lea.sflag [#allocation4], %s1623_s28 }
 0x7ef   : > { %p2035_p2 = pnand %p3043_p1, %p3042_p12 }
 0x7f1   : > { %2371 = dma.done.wait (!%p2035_p2), %s1624_s26, 256  }
 0x7f2   : > { %2373 = vsyncadd (!%p2035_p2), %s1624_s26, 4294967040  ;;  %p26_p13 = scmp.ge.s32.totalorder %s2624_s24, 4   ;;  %s3044_s17 = smov %s2380_s18 }
 0x7f3   : > { %s3045_s18 = smov %s2384_s19  ;;  %s3046_s19 = smov %s2640_s22 }
 0x7f4   : > { %s3047_s20 = smov %s2624_s24  ;;  %28 = sbr.rel (!%p26_p13) target bundleno = 11 (0xb), region = 130 }
 0x7fb   :  { %1629 = vsyncpa [#allocation3], 1 }
 0x7fc   :  { %1631 = vsyncpa [#allocation3 + $0x1], 1 }
 0x7fd   :  { %1632 = vsyncpa [#allocation6], 1 }
 0x7fe   :  { %1633 = vsyncpa [#allocation9], 1 }
 0x7ff   :  { %1634 = vsyncpa [#allocation4], 1 }
 0x800   :  { %1636 = vsyncpa [#allocation4 + $0x1], 1 }

</bundles_post_ra>
